<compile_context>
chip_gen: v5e
topology: v5e:2x2
jax: 0.10.0
libtpu: 0.0.40
codegen_flags: <defaults>
</compile_context>

<pallas_src>
import functools
import math

import numpy as np
import jax
import jax.numpy as jnp
from jax.experimental import pallas as pl
from jax.experimental.pallas import tpu as pltpu

D_MODEL = 32
N_HEADS = 4
D_FF = 64
VOCAB_EN = 50
VOCAB_VN = 60
V_PAD = 128        # vocab padding for the one-hot gather matmul
V_OUT_PAD = 128    # lane-dense padded logits width
EPS = 1e-5
NEG_INF = -1e9

# Row layout of the packed small-parameter matrix ([N_VEC_ROWS, 128]).
(R_E_QKV_B, R_E_O_B, R_E_LN1_G, R_E_LN1_B, R_E_FF1_B, R_E_FF2_B,
 R_E_LN2_G, R_E_LN2_B,
 R_D_QKV_B, R_D_SA_O_B, R_D_LN1_G, R_D_LN1_B,
 R_D_CA_Q_B, R_D_CA_KV_B, R_D_CA_O_B, R_D_LN2_G, R_D_LN2_B,
 R_D_FF1_B, R_D_FF2_B, R_D_LN3_G, R_D_LN3_B, R_OUT_B,
 N_VEC_ROWS) = range(23)


# --------------------------- in-kernel helpers -------------------------------

def _ln(x, g, b):
    mu = jnp.mean(x, axis=-1, keepdims=True)
    var = jnp.mean(jnp.square(x - mu), axis=-1, keepdims=True)
    return (x - mu) * jax.lax.rsqrt(var + EPS) * g + b


def _mha(q, k, v, mask, o_w, o_b, *, B, H, Sq, Sk):
    """Block-diagonal multi-head attention.

    q: [B*Sq, D], k/v: [B*Sk, D]; mask: additive [H*B*Sq, H*B*Sk] with 0 on the
    per-(head, batch) diagonal blocks (plus causal pattern) and -1e9 elsewhere.
    One scores matmul, one softmax, one PV matmul, one output projection.
    """
    D = q.shape[1]
    Dh = D // H
    scale = 1.0 / math.sqrt(Dh)

    # head-major split: rows ordered (head, batch, seq)
    qh = jnp.concatenate([q[:, h * Dh:(h + 1) * Dh] for h in range(H)], axis=0)
    kh = jnp.concatenate([k[:, h * Dh:(h + 1) * Dh] for h in range(H)], axis=0)
    vh = jnp.concatenate([v[:, h * Dh:(h + 1) * Dh] for h in range(H)], axis=0)

    # scores for all (batch, head) blocks in one matmul (contract on last dims)
    s = jax.lax.dot_general(qh, kh, (((1,), (1,)), ((), ())),
                            preferred_element_type=jnp.float32) * scale + mask
    m = jnp.max(s, axis=-1, keepdims=True)
    p = jnp.exp(s - m)
    p = p * pl.reciprocal(jnp.sum(p, axis=-1, keepdims=True), approx=True)

    oh = jnp.dot(p, vh, preferred_element_type=jnp.float32)       # [H*B*Sq, Dh]

    # reassemble heads into lanes once, then a single output projection matmul
    o = jnp.concatenate([oh[h * B * Sq:(h + 1) * B * Sq, :] for h in range(H)],
                        axis=1)                                    # [B*Sq, D]
    return jnp.dot(o, o_w, preferred_element_type=jnp.float32) + o_b


# --------------------------- the fused kernel --------------------------------

def _seq2seq_kernel(
    ids_en_ref, ids_vn_ref, enc_emb_ref, dec_emb_ref, pe_en_ref, pe_vn_ref,
    enc_mask_ref, dec_mask_ref, cross_mask_ref,
    e_qkv_w_ref, e_o_w_ref, e_ff1_w_ref, e_ff2_w_ref,
    d_qkv_w_ref, d_sa_o_w_ref, d_ca_q_w_ref, d_ca_kv_w_ref, d_ca_o_w_ref,
    d_ff1_w_ref, d_ff2_w_ref, out_w_ref, vecs_ref,
    logits_ref,
    *, B, S_en, S_vn, n_heads, v_pad):

    D = D_MODEL
    vecs = vecs_ref[...]

    def vrow(row, n):                      # packed 1-D param -> [1, n]
        return vecs[row:row + 1, :n]

    def embed(ids_ref, emb_ref, pe_ref, n_tok):
        # token gather expressed as a one-hot matmul (table pre-scaled by sqrt(D))
        iota = jax.lax.broadcasted_iota(jnp.int32, (n_tok, v_pad), 1)
        onehot = (iota == ids_ref[...]).astype(jnp.float32)
        return (jnp.dot(onehot, emb_ref[...], preferred_element_type=jnp.float32)
                + pe_ref[...])

    # ------------------------------ encoder ----------------------------------
    x = embed(ids_en_ref, enc_emb_ref, pe_en_ref, B * S_en)        # [B*S_en, D]

    qkv = (jnp.dot(x, e_qkv_w_ref[...], preferred_element_type=jnp.float32)
           + vrow(R_E_QKV_B, 3 * D))
    a = _mha(qkv[:, :D], qkv[:, D:2 * D], qkv[:, 2 * D:], enc_mask_ref[...],
             e_o_w_ref[...], vrow(R_E_O_B, D), B=B, H=n_heads, Sq=S_en, Sk=S_en)
    x = _ln(x + a, vrow(R_E_LN1_G, D), vrow(R_E_LN1_B, D))

    h = jnp.maximum(jnp.dot(x, e_ff1_w_ref[...], preferred_element_type=jnp.float32)
                    + vrow(R_E_FF1_B, D_FF), 0.0)
    f = (jnp.dot(h, e_ff2_w_ref[...], preferred_element_type=jnp.float32)
         + vrow(R_E_FF2_B, D))
    ctx = _ln(x + f, vrow(R_E_LN2_G, D), vrow(R_E_LN2_B, D))       # [B*S_en, D]

    # ------------------------------ decoder ----------------------------------
    y = embed(ids_vn_ref, dec_emb_ref, pe_vn_ref, B * S_vn)        # [B*S_vn, D]

    # masked (causal) self-attention
    qkv = (jnp.dot(y, d_qkv_w_ref[...], preferred_element_type=jnp.float32)
           + vrow(R_D_QKV_B, 3 * D))
    a = _mha(qkv[:, :D], qkv[:, D:2 * D], qkv[:, 2 * D:], dec_mask_ref[...],
             d_sa_o_w_ref[...], vrow(R_D_SA_O_B, D), B=B, H=n_heads, Sq=S_vn, Sk=S_vn)
    y = _ln(y + a, vrow(R_D_LN1_G, D), vrow(R_D_LN1_B, D))

    # cross-attention over encoder context
    q = (jnp.dot(y, d_ca_q_w_ref[...], preferred_element_type=jnp.float32)
         + vrow(R_D_CA_Q_B, D))
    kv = (jnp.dot(ctx, d_ca_kv_w_ref[...], preferred_element_type=jnp.float32)
          + vrow(R_D_CA_KV_B, 2 * D))
    c = _mha(q, kv[:, :D], kv[:, D:], cross_mask_ref[...],
             d_ca_o_w_ref[...], vrow(R_D_CA_O_B, D), B=B, H=n_heads, Sq=S_vn, Sk=S_en)
    y = _ln(y + c, vrow(R_D_LN2_G, D), vrow(R_D_LN2_B, D))

    # feed-forward + final norm
    h = jnp.maximum(jnp.dot(y, d_ff1_w_ref[...], preferred_element_type=jnp.float32)
                    + vrow(R_D_FF1_B, D_FF), 0.0)
    f = (jnp.dot(h, d_ff2_w_ref[...], preferred_element_type=jnp.float32)
         + vrow(R_D_FF2_B, D))
    y = _ln(y + f, vrow(R_D_LN3_G, D), vrow(R_D_LN3_B, D))

    # lane-dense (128-padded) output projection to target vocabulary
    logits_ref[...] = (jnp.dot(y, out_w_ref[...], preferred_element_type=jnp.float32)
                       + vrow(R_OUT_B, V_OUT_PAD))


# --------------------------- trace-time constants ----------------------------

def _positional_encoding_np(seq_len, d_model):
    pos = np.arange(seq_len, dtype=np.float32)[:, None]
    i = np.arange(d_model // 2, dtype=np.float32)[None, :]
    angle = pos / np.power(10000.0, 2.0 * i / d_model)
    pe = np.zeros((seq_len, d_model), np.float32)
    pe[:, 0::2] = np.sin(angle)
    pe[:, 1::2] = np.cos(angle)
    return pe


def _block_attn_mask_np(B, H, Sq, Sk, causal):
    """Additive mask: 0 on the per-(head, batch) diagonal blocks (+causal), -1e9 off."""
    m = np.full((H * B * Sq, H * B * Sk), NEG_INF, dtype=np.float32)
    if causal:
        blk = np.where(np.arange(Sq)[:, None] >= np.arange(Sk)[None, :], 0.0, NEG_INF)
    else:
        blk = np.zeros((Sq, Sk), np.float32)
    for g in range(H * B):
        m[g * Sq:(g + 1) * Sq, g * Sk:(g + 1) * Sk] = blk
    return m.astype(np.float32)


# --------------------------- one-time parameter prep -------------------------

def prepare_params(p):
    """Hoists all weight concats / padding / vector packing out of the forward."""
    D = D_MODEL
    sqrt_d = math.sqrt(D)

    e_qkv_w = jnp.concatenate([p["enc_sa_q_w"], p["enc_sa_k_w"], p["enc_sa_v_w"]], axis=1)
    d_qkv_w = jnp.concatenate([p["dec_sa_q_w"], p["dec_sa_k_w"], p["dec_sa_v_w"]], axis=1)
    d_ca_kv_w = jnp.concatenate([p["dec_ca_k_w"], p["dec_ca_v_w"]], axis=1)

    def pad_table(t):   # vocab-padded, pre-scaled embedding table
        out = jnp.zeros((V_PAD, D), jnp.float32)
        return out.at[:t.shape[0]].set(t * sqrt_d)

    enc_emb = pad_table(p["enc_embed"])
    dec_emb = pad_table(p["dec_embed"])

    out_w = jnp.zeros((D, V_OUT_PAD), jnp.float32).at[:, :VOCAB_VN].set(p["out_w"])

    vec_rows = [
        (R_E_QKV_B, jnp.concatenate([p["enc_sa_q_b"], p["enc_sa_k_b"], p["enc_sa_v_b"]])),
        (R_E_O_B, p["enc_sa_o_b"]),
        (R_E_LN1_G, p["enc_ln1_g"]), (R_E_LN1_B, p["enc_ln1_b"]),
        (R_E_FF1_B, p["enc_ff1_b"]), (R_E_FF2_B, p["enc_ff2_b"]),
        (R_E_LN2_G, p["enc_ln2_g"]), (R_E_LN2_B, p["enc_ln2_b"]),
        (R_D_QKV_B, jnp.concatenate([p["dec_sa_q_b"], p["dec_sa_k_b"], p["dec_sa_v_b"]])),
        (R_D_SA_O_B, p["dec_sa_o_b"]),
        (R_D_LN1_G, p["dec_ln1_g"]), (R_D_LN1_B, p["dec_ln1_b"]),
        (R_D_CA_Q_B, p["dec_ca_q_b"]),
        (R_D_CA_KV_B, jnp.concatenate([p["dec_ca_k_b"], p["dec_ca_v_b"]])),
        (R_D_CA_O_B, p["dec_ca_o_b"]),
        (R_D_LN2_G, p["dec_ln2_g"]), (R_D_LN2_B, p["dec_ln2_b"]),
        (R_D_FF1_B, p["dec_ff1_b"]), (R_D_FF2_B, p["dec_ff2_b"]),
        (R_D_LN3_G, p["dec_ln3_g"]), (R_D_LN3_B, p["dec_ln3_b"]),
        (R_OUT_B, p["out_b"]),
    ]
    vecs = jnp.zeros((N_VEC_ROWS, 128), jnp.float32)
    for row, val in vec_rows:
        vecs = vecs.at[row, :val.shape[0]].set(val)

    return dict(
        enc_emb=enc_emb, dec_emb=dec_emb, out_w=out_w, vecs=vecs,
        e_qkv_w=e_qkv_w, e_o_w=p["enc_sa_o_w"],
        e_ff1_w=p["enc_ff1_w"], e_ff2_w=p["enc_ff2_w"],
        d_qkv_w=d_qkv_w, d_sa_o_w=p["dec_sa_o_w"],
        d_ca_q_w=p["dec_ca_q_w"], d_ca_kv_w=d_ca_kv_w, d_ca_o_w=p["dec_ca_o_w"],
        d_ff1_w=p["dec_ff1_w"], d_ff2_w=p["dec_ff2_w"],
    )


# --------------------------- model forward (wrapper) -------------------------

def transformer_seq2seq(sequence_en, sequence_vn, prepped):
    # Mirrors Transformer_Seq2Seq_Model.forward:
    #   context = encoder(sequence_en); outputs = decoder(sequence_vn, context)
    B, S_en = sequence_en.shape
    S_vn = sequence_vn.shape[1]
    D, H = D_MODEL, N_HEADS

    ids_en = sequence_en.reshape(B * S_en, 1).astype(jnp.int32)
    ids_vn = sequence_vn.reshape(B * S_vn, 1).astype(jnp.int32)

    # trace-time constants (numpy): PE tiled over batch + additive attention masks
    pe_en = jnp.asarray(np.tile(_positional_encoding_np(S_en, D), (B, 1)))
    pe_vn = jnp.asarray(np.tile(_positional_encoding_np(S_vn, D), (B, 1)))
    enc_mask = jnp.asarray(_block_attn_mask_np(B, H, S_en, S_en, causal=False))
    dec_mask = jnp.asarray(_block_attn_mask_np(B, H, S_vn, S_vn, causal=True))
    cross_mask = jnp.asarray(_block_attn_mask_np(B, H, S_vn, S_en, causal=False))

    inputs = (
        ids_en, ids_vn, prepped["enc_emb"], prepped["dec_emb"], pe_en, pe_vn,
        enc_mask, dec_mask, cross_mask,
        prepped["e_qkv_w"], prepped["e_o_w"], prepped["e_ff1_w"], prepped["e_ff2_w"],
        prepped["d_qkv_w"], prepped["d_sa_o_w"], prepped["d_ca_q_w"],
        prepped["d_ca_kv_w"], prepped["d_ca_o_w"], prepped["d_ff1_w"],
        prepped["d_ff2_w"], prepped["out_w"], prepped["vecs"],
    )

    kernel = functools.partial(_seq2seq_kernel, B=B, S_en=S_en, S_vn=S_vn,
                               n_heads=H, v_pad=V_PAD)
    logits_padded = pl.pallas_call(
        kernel,
        out_shape=jax.ShapeDtypeStruct((B * S_vn, V_OUT_PAD), jnp.float32),
        in_specs=[pl.BlockSpec(memory_space=pltpu.MemorySpace.VMEM)] * len(inputs),
        out_specs=pl.BlockSpec(memory_space=pltpu.MemorySpace.VMEM),
    )(*inputs)
    return logits_padded.reshape(B, S_vn, V_OUT_PAD)[:, :, :VOCAB_VN]


# --------------------------- deterministic init ------------------------------

def init_params(key):
    p = {}
    keys = iter(jax.random.split(key, 64))

    def dense(name, fan_in, fan_out):
        p[name + "_w"] = 0.02 * jax.random.normal(next(keys), (fan_in, fan_out), jnp.float32)
        p[name + "_b"] = jnp.zeros((fan_out,), jnp.float32)

    p["enc_embed"] = 0.02 * jax.random.normal(next(keys), (VOCAB_EN, D_MODEL), jnp.float32)
    p["dec_embed"] = 0.02 * jax.random.normal(next(keys), (VOCAB_VN, D_MODEL), jnp.float32)
    for pre in ("enc_sa_", "dec_sa_", "dec_ca_"):
        for n in ("q", "k", "v", "o"):
            dense(pre + n, D_MODEL, D_MODEL)
    dense("enc_ff1", D_MODEL, D_FF)
    dense("enc_ff2", D_FF, D_MODEL)
    dense("dec_ff1", D_MODEL, D_FF)
    dense("dec_ff2", D_FF, D_MODEL)
    dense("out", D_MODEL, VOCAB_VN)
    for n in ("enc_ln1", "enc_ln2", "dec_ln1", "dec_ln2", "dec_ln3"):
        p[n + "_g"] = jnp.ones((D_MODEL,), jnp.float32)
        p[n + "_b"] = jnp.zeros((D_MODEL,), jnp.float32)
    return p


if __name__ == "__main__":
    key = jax.random.PRNGKey(0)
    pkey, ekey, vkey = jax.random.split(key, 3)
    params = init_params(pkey)
    prepped = prepare_params(params)     # one-time prep, hoisted out of the forward

    B, S_EN, S_VN = 2, 8, 8
    sequence_en = jax.random.randint(ekey, (B, S_EN), 0, VOCAB_EN, dtype=jnp.int32)
    sequence_vn = jax.random.randint(vkey, (B, S_VN), 0, VOCAB_VN, dtype=jnp.int32)

    fwd = jax.jit(transformer_seq2seq)
    outputs = fwd(sequence_en, sequence_vn, prepped)
    jax.block_until_ready(outputs)
    assert outputs.shape == (B, S_VN, VOCAB_VN)
    assert outputs.dtype == jnp.float32
    print("KERNEL_OK")
</pallas_src>

<mosaic_0001>
module attributes {stable_mosaic.version = 11 : i64} {
  func.func @_seq2seq_kernel(%arg0: memref<16x1xi32, #tpu.memory_space<vmem>>, %arg1: memref<16x1xi32, #tpu.memory_space<vmem>>, %arg2: memref<128x32xf32, #tpu.memory_space<vmem>>, %arg3: memref<128x32xf32, #tpu.memory_space<vmem>>, %arg4: memref<16x32xf32, #tpu.memory_space<vmem>>, %arg5: memref<16x32xf32, #tpu.memory_space<vmem>>, %arg6: memref<64x64xf32, #tpu.memory_space<vmem>>, %arg7: memref<64x64xf32, #tpu.memory_space<vmem>>, %arg8: memref<64x64xf32, #tpu.memory_space<vmem>>, %arg9: memref<32x96xf32, #tpu.memory_space<vmem>>, %arg10: memref<32x32xf32, #tpu.memory_space<vmem>>, %arg11: memref<32x64xf32, #tpu.memory_space<vmem>>, %arg12: memref<64x32xf32, #tpu.memory_space<vmem>>, %arg13: memref<32x96xf32, #tpu.memory_space<vmem>>, %arg14: memref<32x32xf32, #tpu.memory_space<vmem>>, %arg15: memref<32x32xf32, #tpu.memory_space<vmem>>, %arg16: memref<32x64xf32, #tpu.memory_space<vmem>>, %arg17: memref<32x32xf32, #tpu.memory_space<vmem>>, %arg18: memref<32x64xf32, #tpu.memory_space<vmem>>, %arg19: memref<64x32xf32, #tpu.memory_space<vmem>>, %arg20: memref<32x128xf32, #tpu.memory_space<vmem>>, %arg21: memref<22x128xf32, #tpu.memory_space<vmem>>, %arg22: memref<16x128xf32, #tpu.memory_space<vmem>>) attributes {dimension_semantics = [], scalar_prefetch = 0 : i64, scratch_operands = 0 : i64, tpu.core_type = #tpu.core_type<tc>} {
    %c0 = arith.constant 0 : index
    %c0_0 = arith.constant 0 : index
    %0 = vector.load %arg21[%c0, %c0_0] : memref<22x128xf32, #tpu.memory_space<vmem>>, vector<22x128xf32>
    %1 = tpu.iota {dimensions = array<i32: 1>} : vector<16x128xi32>
    %c0_1 = arith.constant 0 : index
    %c0_2 = arith.constant 0 : index
    %2 = vector.load %arg0[%c0_1, %c0_2] : memref<16x1xi32, #tpu.memory_space<vmem>>, vector<16x1xi32>
    %3 = vector.broadcast %2 : vector<16x1xi32> to vector<16x128xi32>
    %4 = arith.cmpi eq, %1, %3 : vector<16x128xi32>
    %5 = arith.extui %4 : vector<16x128xi1> to vector<16x128xi32>
    %6 = arith.sitofp %5 : vector<16x128xi32> to vector<16x128xf32>
    %c0_3 = arith.constant 0 : index
    %c0_4 = arith.constant 0 : index
    %7 = vector.load %arg2[%c0_3, %c0_4] : memref<128x32xf32, #tpu.memory_space<vmem>>, vector<128x32xf32>
    %cst = arith.constant dense<0.000000e+00> : vector<16x32xf32>
    %8 = tpu.matmul %6, %7, %cst {dimension_numbers = #tpu.dot_dimension_numbers<[1], [0], [0], [1], [0, 0, 1, 1], [], []>} : vector<16x128xf32>, vector<128x32xf32>, vector<16x32xf32> -> vector<16x32xf32>
    %c0_5 = arith.constant 0 : index
    %c0_6 = arith.constant 0 : index
    %9 = vector.load %arg4[%c0_5, %c0_6] : memref<16x32xf32, #tpu.memory_space<vmem>>, vector<16x32xf32>
    %10 = arith.addf %8, %9 : vector<16x32xf32>
    %c0_7 = arith.constant 0 : index
    %c0_8 = arith.constant 0 : index
    %11 = vector.load %arg9[%c0_7, %c0_8] : memref<32x96xf32, #tpu.memory_space<vmem>>, vector<32x96xf32>
    %cst_9 = arith.constant dense<0.000000e+00> : vector<16x96xf32>
    %12 = tpu.matmul %10, %11, %cst_9 {dimension_numbers = #tpu.dot_dimension_numbers<[1], [0], [0], [1], [0, 0, 1, 1], [], []>} : vector<16x32xf32>, vector<32x96xf32>, vector<16x96xf32> -> vector<16x96xf32>
    %13 = vector.extract_strided_slice %0 {offsets = [0, 0], sizes = [1, 96], strides = [1, 1]} : vector<22x128xf32> to vector<1x96xf32>
    %14 = vector.broadcast %13 : vector<1x96xf32> to vector<16x96xf32>
    %15 = arith.addf %12, %14 : vector<16x96xf32>
    %16 = vector.extract_strided_slice %15 {offsets = [0, 0], sizes = [16, 32], strides = [1, 1]} : vector<16x96xf32> to vector<16x32xf32>
    %17 = vector.extract_strided_slice %15 {offsets = [0, 32], sizes = [16, 32], strides = [1, 1]} : vector<16x96xf32> to vector<16x32xf32>
    %18 = vector.extract_strided_slice %15 {offsets = [0, 64], sizes = [16, 32], strides = [1, 1]} : vector<16x96xf32> to vector<16x32xf32>
    %c0_10 = arith.constant 0 : index
    %c0_11 = arith.constant 0 : index
    %19 = vector.load %arg6[%c0_10, %c0_11] : memref<64x64xf32, #tpu.memory_space<vmem>>, vector<64x64xf32>
    %c0_12 = arith.constant 0 : index
    %c0_13 = arith.constant 0 : index
    %20 = vector.load %arg10[%c0_12, %c0_13] : memref<32x32xf32, #tpu.memory_space<vmem>>, vector<32x32xf32>
    %21 = vector.extract_strided_slice %0 {offsets = [1, 0], sizes = [1, 32], strides = [1, 1]} : vector<22x128xf32> to vector<1x32xf32>
    %22 = vector.extract_strided_slice %16 {offsets = [0, 0], sizes = [16, 8], strides = [1, 1]} : vector<16x32xf32> to vector<16x8xf32>
    %23 = vector.extract_strided_slice %16 {offsets = [0, 8], sizes = [16, 8], strides = [1, 1]} : vector<16x32xf32> to vector<16x8xf32>
    %24 = vector.extract_strided_slice %16 {offsets = [0, 16], sizes = [16, 8], strides = [1, 1]} : vector<16x32xf32> to vector<16x8xf32>
    %25 = vector.extract_strided_slice %16 {offsets = [0, 24], sizes = [16, 8], strides = [1, 1]} : vector<16x32xf32> to vector<16x8xf32>
    %26 = tpu.concatenate %22, %23, %24, %25 in 0 : vector<16x8xf32>, vector<16x8xf32>, vector<16x8xf32>, vector<16x8xf32> -> vector<64x8xf32>
    %27 = vector.extract_strided_slice %17 {offsets = [0, 0], sizes = [16, 8], strides = [1, 1]} : vector<16x32xf32> to vector<16x8xf32>
    %28 = vector.extract_strided_slice %17 {offsets = [0, 8], sizes = [16, 8], strides = [1, 1]} : vector<16x32xf32> to vector<16x8xf32>
    %29 = vector.extract_strided_slice %17 {offsets = [0, 16], sizes = [16, 8], strides = [1, 1]} : vector<16x32xf32> to vector<16x8xf32>
    %30 = vector.extract_strided_slice %17 {offsets = [0, 24], sizes = [16, 8], strides = [1, 1]} : vector<16x32xf32> to vector<16x8xf32>
    %31 = tpu.concatenate %27, %28, %29, %30 in 0 : vector<16x8xf32>, vector<16x8xf32>, vector<16x8xf32>, vector<16x8xf32> -> vector<64x8xf32>
    %32 = vector.extract_strided_slice %18 {offsets = [0, 0], sizes = [16, 8], strides = [1, 1]} : vector<16x32xf32> to vector<16x8xf32>
    %33 = vector.extract_strided_slice %18 {offsets = [0, 8], sizes = [16, 8], strides = [1, 1]} : vector<16x32xf32> to vector<16x8xf32>
    %34 = vector.extract_strided_slice %18 {offsets = [0, 16], sizes = [16, 8], strides = [1, 1]} : vector<16x32xf32> to vector<16x8xf32>
    %35 = vector.extract_strided_slice %18 {offsets = [0, 24], sizes = [16, 8], strides = [1, 1]} : vector<16x32xf32> to vector<16x8xf32>
    %36 = tpu.concatenate %32, %33, %34, %35 in 0 : vector<16x8xf32>, vector<16x8xf32>, vector<16x8xf32>, vector<16x8xf32> -> vector<64x8xf32>
    %cst_14 = arith.constant dense<0.000000e+00> : vector<64x64xf32>
    %37 = tpu.matmul %26, %31, %cst_14 {dimension_numbers = #tpu.dot_dimension_numbers<[1], [1], [0], [0], [0, 0, 1, 0], [], []>} : vector<64x8xf32>, vector<64x8xf32>, vector<64x64xf32> -> vector<64x64xf32>
    %cst_15 = arith.constant 0.353553385 : f32
    %38 = vector.broadcast %cst_15 : f32 to vector<64x64xf32>
    %39 = arith.mulf %37, %38 : vector<64x64xf32>
    %40 = arith.addf %39, %19 : vector<64x64xf32>
    %cst_16 = arith.constant dense<0xFF800000> : vector<64xf32>
    %41 = vector.multi_reduction <maximumf>, %40, %cst_16 [1] : vector<64x64xf32> to vector<64xf32>
    %42 = vector.shape_cast %41 : vector<64xf32> to vector<64x1xf32>
    %43 = vector.broadcast %42 : vector<64x1xf32> to vector<64x64xf32>
    %44 = arith.subf %40, %43 : vector<64x64xf32>
    %45 = math.exp %44 : vector<64x64xf32>
    %cst_17 = arith.constant dense<0.000000e+00> : vector<64xf32>
    %46 = vector.multi_reduction <add>, %45, %cst_17 [1] : vector<64x64xf32> to vector<64xf32>
    %47 = vector.shape_cast %46 : vector<64xf32> to vector<64x1xf32>
    %48 = tpu.reciprocal %47 {approx = true} : vector<64x1xf32> -> vector<64x1xf32>
    %49 = vector.broadcast %48 : vector<64x1xf32> to vector<64x64xf32>
    %50 = arith.mulf %45, %49 : vector<64x64xf32>
    %cst_18 = arith.constant dense<0.000000e+00> : vector<64x8xf32>
    %51 = tpu.matmul %50, %36, %cst_18 {dimension_numbers = #tpu.dot_dimension_numbers<[1], [0], [0], [1], [0, 0, 1, 1], [], []>} : vector<64x64xf32>, vector<64x8xf32>, vector<64x8xf32> -> vector<64x8xf32>
    %52 = vector.extract_strided_slice %51 {offsets = [0, 0], sizes = [16, 8], strides = [1, 1]} : vector<64x8xf32> to vector<16x8xf32>
    %53 = vector.extract_strided_slice %51 {offsets = [16, 0], sizes = [16, 8], strides = [1, 1]} : vector<64x8xf32> to vector<16x8xf32>
    %54 = vector.extract_strided_slice %51 {offsets = [32, 0], sizes = [16, 8], strides = [1, 1]} : vector<64x8xf32> to vector<16x8xf32>
    %55 = vector.extract_strided_slice %51 {offsets = [48, 0], sizes = [16, 8], strides = [1, 1]} : vector<64x8xf32> to vector<16x8xf32>
    %56 = tpu.concatenate %52, %53, %54, %55 in 1 : vector<16x8xf32>, vector<16x8xf32>, vector<16x8xf32>, vector<16x8xf32> -> vector<16x32xf32>
    %cst_19 = arith.constant dense<0.000000e+00> : vector<16x32xf32>
    %57 = tpu.matmul %56, %20, %cst_19 {dimension_numbers = #tpu.dot_dimension_numbers<[1], [0], [0], [1], [0, 0, 1, 1], [], []>} : vector<16x32xf32>, vector<32x32xf32>, vector<16x32xf32> -> vector<16x32xf32>
    %58 = vector.broadcast %21 : vector<1x32xf32> to vector<16x32xf32>
    %59 = arith.addf %57, %58 : vector<16x32xf32>
    %60 = arith.addf %10, %59 : vector<16x32xf32>
    %61 = vector.extract_strided_slice %0 {offsets = [2, 0], sizes = [1, 32], strides = [1, 1]} : vector<22x128xf32> to vector<1x32xf32>
    %62 = vector.extract_strided_slice %0 {offsets = [3, 0], sizes = [1, 32], strides = [1, 1]} : vector<22x128xf32> to vector<1x32xf32>
    %cst_20 = arith.constant dense<0.000000e+00> : vector<16xf32>
    %63 = vector.multi_reduction <add>, %60, %cst_20 [1] : vector<16x32xf32> to vector<16xf32>
    %64 = vector.shape_cast %63 : vector<16xf32> to vector<16x1xf32>
    %cst_21 = arith.constant 3.200000e+01 : f32
    %65 = vector.broadcast %cst_21 : f32 to vector<16x1xf32>
    %66 = arith.divf %64, %65 : vector<16x1xf32>
    %67 = vector.broadcast %66 : vector<16x1xf32> to vector<16x32xf32>
    %68 = arith.subf %60, %67 : vector<16x32xf32>
    %69 = arith.mulf %68, %68 : vector<16x32xf32>
    %cst_22 = arith.constant dense<0.000000e+00> : vector<16xf32>
    %70 = vector.multi_reduction <add>, %69, %cst_22 [1] : vector<16x32xf32> to vector<16xf32>
    %71 = vector.shape_cast %70 : vector<16xf32> to vector<16x1xf32>
    %cst_23 = arith.constant 3.200000e+01 : f32
    %72 = vector.broadcast %cst_23 : f32 to vector<16x1xf32>
    %73 = arith.divf %71, %72 : vector<16x1xf32>
    %74 = vector.broadcast %66 : vector<16x1xf32> to vector<16x32xf32>
    %75 = arith.subf %60, %74 : vector<16x32xf32>
    %cst_24 = arith.constant 9.99999974E-6 : f32
    %76 = vector.broadcast %cst_24 : f32 to vector<16x1xf32>
    %77 = arith.addf %73, %76 : vector<16x1xf32>
    %78 = math.rsqrt %77 : vector<16x1xf32>
    %79 = vector.broadcast %78 : vector<16x1xf32> to vector<16x32xf32>
    %80 = arith.mulf %75, %79 : vector<16x32xf32>
    %81 = vector.broadcast %61 : vector<1x32xf32> to vector<16x32xf32>
    %82 = arith.mulf %80, %81 : vector<16x32xf32>
    %83 = vector.broadcast %62 : vector<1x32xf32> to vector<16x32xf32>
    %84 = arith.addf %82, %83 : vector<16x32xf32>
    %c0_25 = arith.constant 0 : index
    %c0_26 = arith.constant 0 : index
    %85 = vector.load %arg11[%c0_25, %c0_26] : memref<32x64xf32, #tpu.memory_space<vmem>>, vector<32x64xf32>
    %cst_27 = arith.constant dense<0.000000e+00> : vector<16x64xf32>
    %86 = tpu.matmul %84, %85, %cst_27 {dimension_numbers = #tpu.dot_dimension_numbers<[1], [0], [0], [1], [0, 0, 1, 1], [], []>} : vector<16x32xf32>, vector<32x64xf32>, vector<16x64xf32> -> vector<16x64xf32>
    %87 = vector.extract_strided_slice %0 {offsets = [4, 0], sizes = [1, 64], strides = [1, 1]} : vector<22x128xf32> to vector<1x64xf32>
    %88 = vector.broadcast %87 : vector<1x64xf32> to vector<16x64xf32>
    %89 = arith.addf %86, %88 : vector<16x64xf32>
    %cst_28 = arith.constant 0.000000e+00 : f32
    %90 = vector.broadcast %cst_28 : f32 to vector<16x64xf32>
    %91 = arith.maximumf %89, %90 : vector<16x64xf32>
    %c0_29 = arith.constant 0 : index
    %c0_30 = arith.constant 0 : index
    %92 = vector.load %arg12[%c0_29, %c0_30] : memref<64x32xf32, #tpu.memory_space<vmem>>, vector<64x32xf32>
    %cst_31 = arith.constant dense<0.000000e+00> : vector<16x32xf32>
    %93 = tpu.matmul %91, %92, %cst_31 {dimension_numbers = #tpu.dot_dimension_numbers<[1], [0], [0], [1], [0, 0, 1, 1], [], []>} : vector<16x64xf32>, vector<64x32xf32>, vector<16x32xf32> -> vector<16x32xf32>
    %94 = vector.extract_strided_slice %0 {offsets = [5, 0], sizes = [1, 32], strides = [1, 1]} : vector<22x128xf32> to vector<1x32xf32>
    %95 = vector.broadcast %94 : vector<1x32xf32> to vector<16x32xf32>
    %96 = arith.addf %93, %95 : vector<16x32xf32>
    %97 = arith.addf %84, %96 : vector<16x32xf32>
    %98 = vector.extract_strided_slice %0 {offsets = [6, 0], sizes = [1, 32], strides = [1, 1]} : vector<22x128xf32> to vector<1x32xf32>
    %99 = vector.extract_strided_slice %0 {offsets = [7, 0], sizes = [1, 32], strides = [1, 1]} : vector<22x128xf32> to vector<1x32xf32>
    %cst_32 = arith.constant dense<0.000000e+00> : vector<16xf32>
    %100 = vector.multi_reduction <add>, %97, %cst_32 [1] : vector<16x32xf32> to vector<16xf32>
    %101 = vector.shape_cast %100 : vector<16xf32> to vector<16x1xf32>
    %cst_33 = arith.constant 3.200000e+01 : f32
    %102 = vector.broadcast %cst_33 : f32 to vector<16x1xf32>
    %103 = arith.divf %101, %102 : vector<16x1xf32>
    %104 = vector.broadcast %103 : vector<16x1xf32> to vector<16x32xf32>
    %105 = arith.subf %97, %104 : vector<16x32xf32>
    %106 = arith.mulf %105, %105 : vector<16x32xf32>
    %cst_34 = arith.constant dense<0.000000e+00> : vector<16xf32>
    %107 = vector.multi_reduction <add>, %106, %cst_34 [1] : vector<16x32xf32> to vector<16xf32>
    %108 = vector.shape_cast %107 : vector<16xf32> to vector<16x1xf32>
    %cst_35 = arith.constant 3.200000e+01 : f32
    %109 = vector.broadcast %cst_35 : f32 to vector<16x1xf32>
    %110 = arith.divf %108, %109 : vector<16x1xf32>
    %111 = vector.broadcast %103 : vector<16x1xf32> to vector<16x32xf32>
    %112 = arith.subf %97, %111 : vector<16x32xf32>
    %cst_36 = arith.constant 9.99999974E-6 : f32
    %113 = vector.broadcast %cst_36 : f32 to vector<16x1xf32>
    %114 = arith.addf %110, %113 : vector<16x1xf32>
    %115 = math.rsqrt %114 : vector<16x1xf32>
    %116 = vector.broadcast %115 : vector<16x1xf32> to vector<16x32xf32>
    %117 = arith.mulf %112, %116 : vector<16x32xf32>
    %118 = vector.broadcast %98 : vector<1x32xf32> to vector<16x32xf32>
    %119 = arith.mulf %117, %118 : vector<16x32xf32>
    %120 = vector.broadcast %99 : vector<1x32xf32> to vector<16x32xf32>
    %121 = arith.addf %119, %120 : vector<16x32xf32>
    %122 = tpu.iota {dimensions = array<i32: 1>} : vector<16x128xi32>
    %c0_37 = arith.constant 0 : index
    %c0_38 = arith.constant 0 : index
    %123 = vector.load %arg1[%c0_37, %c0_38] : memref<16x1xi32, #tpu.memory_space<vmem>>, vector<16x1xi32>
    %124 = vector.broadcast %123 : vector<16x1xi32> to vector<16x128xi32>
    %125 = arith.cmpi eq, %122, %124 : vector<16x128xi32>
    %126 = arith.extui %125 : vector<16x128xi1> to vector<16x128xi32>
    %127 = arith.sitofp %126 : vector<16x128xi32> to vector<16x128xf32>
    %c0_39 = arith.constant 0 : index
    %c0_40 = arith.constant 0 : index
    %128 = vector.load %arg3[%c0_39, %c0_40] : memref<128x32xf32, #tpu.memory_space<vmem>>, vector<128x32xf32>
    %cst_41 = arith.constant dense<0.000000e+00> : vector<16x32xf32>
    %129 = tpu.matmul %127, %128, %cst_41 {dimension_numbers = #tpu.dot_dimension_numbers<[1], [0], [0], [1], [0, 0, 1, 1], [], []>} : vector<16x128xf32>, vector<128x32xf32>, vector<16x32xf32> -> vector<16x32xf32>
    %c0_42 = arith.constant 0 : index
    %c0_43 = arith.constant 0 : index
    %130 = vector.load %arg5[%c0_42, %c0_43] : memref<16x32xf32, #tpu.memory_space<vmem>>, vector<16x32xf32>
    %131 = arith.addf %129, %130 : vector<16x32xf32>
    %c0_44 = arith.constant 0 : index
    %c0_45 = arith.constant 0 : index
    %132 = vector.load %arg13[%c0_44, %c0_45] : memref<32x96xf32, #tpu.memory_space<vmem>>, vector<32x96xf32>
    %cst_46 = arith.constant dense<0.000000e+00> : vector<16x96xf32>
    %133 = tpu.matmul %131, %132, %cst_46 {dimension_numbers = #tpu.dot_dimension_numbers<[1], [0], [0], [1], [0, 0, 1, 1], [], []>} : vector<16x32xf32>, vector<32x96xf32>, vector<16x96xf32> -> vector<16x96xf32>
    %134 = vector.extract_strided_slice %0 {offsets = [8, 0], sizes = [1, 96], strides = [1, 1]} : vector<22x128xf32> to vector<1x96xf32>
    %135 = vector.broadcast %134 : vector<1x96xf32> to vector<16x96xf32>
    %136 = arith.addf %133, %135 : vector<16x96xf32>
    %137 = vector.extract_strided_slice %136 {offsets = [0, 0], sizes = [16, 32], strides = [1, 1]} : vector<16x96xf32> to vector<16x32xf32>
    %138 = vector.extract_strided_slice %136 {offsets = [0, 32], sizes = [16, 32], strides = [1, 1]} : vector<16x96xf32> to vector<16x32xf32>
    %139 = vector.extract_strided_slice %136 {offsets = [0, 64], sizes = [16, 32], strides = [1, 1]} : vector<16x96xf32> to vector<16x32xf32>
    %c0_47 = arith.constant 0 : index
    %c0_48 = arith.constant 0 : index
    %140 = vector.load %arg7[%c0_47, %c0_48] : memref<64x64xf32, #tpu.memory_space<vmem>>, vector<64x64xf32>
    %c0_49 = arith.constant 0 : index
    %c0_50 = arith.constant 0 : index
    %141 = vector.load %arg14[%c0_49, %c0_50] : memref<32x32xf32, #tpu.memory_space<vmem>>, vector<32x32xf32>
    %142 = vector.extract_strided_slice %0 {offsets = [9, 0], sizes = [1, 32], strides = [1, 1]} : vector<22x128xf32> to vector<1x32xf32>
    %143 = vector.extract_strided_slice %137 {offsets = [0, 0], sizes = [16, 8], strides = [1, 1]} : vector<16x32xf32> to vector<16x8xf32>
    %144 = vector.extract_strided_slice %137 {offsets = [0, 8], sizes = [16, 8], strides = [1, 1]} : vector<16x32xf32> to vector<16x8xf32>
    %145 = vector.extract_strided_slice %137 {offsets = [0, 16], sizes = [16, 8], strides = [1, 1]} : vector<16x32xf32> to vector<16x8xf32>
    %146 = vector.extract_strided_slice %137 {offsets = [0, 24], sizes = [16, 8], strides = [1, 1]} : vector<16x32xf32> to vector<16x8xf32>
    %147 = tpu.concatenate %143, %144, %145, %146 in 0 : vector<16x8xf32>, vector<16x8xf32>, vector<16x8xf32>, vector<16x8xf32> -> vector<64x8xf32>
    %148 = vector.extract_strided_slice %138 {offsets = [0, 0], sizes = [16, 8], strides = [1, 1]} : vector<16x32xf32> to vector<16x8xf32>
    %149 = vector.extract_strided_slice %138 {offsets = [0, 8], sizes = [16, 8], strides = [1, 1]} : vector<16x32xf32> to vector<16x8xf32>
    %150 = vector.extract_strided_slice %138 {offsets = [0, 16], sizes = [16, 8], strides = [1, 1]} : vector<16x32xf32> to vector<16x8xf32>
    %151 = vector.extract_strided_slice %138 {offsets = [0, 24], sizes = [16, 8], strides = [1, 1]} : vector<16x32xf32> to vector<16x8xf32>
    %152 = tpu.concatenate %148, %149, %150, %151 in 0 : vector<16x8xf32>, vector<16x8xf32>, vector<16x8xf32>, vector<16x8xf32> -> vector<64x8xf32>
    %153 = vector.extract_strided_slice %139 {offsets = [0, 0], sizes = [16, 8], strides = [1, 1]} : vector<16x32xf32> to vector<16x8xf32>
    %154 = vector.extract_strided_slice %139 {offsets = [0, 8], sizes = [16, 8], strides = [1, 1]} : vector<16x32xf32> to vector<16x8xf32>
    %155 = vector.extract_strided_slice %139 {offsets = [0, 16], sizes = [16, 8], strides = [1, 1]} : vector<16x32xf32> to vector<16x8xf32>
    %156 = vector.extract_strided_slice %139 {offsets = [0, 24], sizes = [16, 8], strides = [1, 1]} : vector<16x32xf32> to vector<16x8xf32>
    %157 = tpu.concatenate %153, %154, %155, %156 in 0 : vector<16x8xf32>, vector<16x8xf32>, vector<16x8xf32>, vector<16x8xf32> -> vector<64x8xf32>
    %cst_51 = arith.constant dense<0.000000e+00> : vector<64x64xf32>
    %158 = tpu.matmul %147, %152, %cst_51 {dimension_numbers = #tpu.dot_dimension_numbers<[1], [1], [0], [0], [0, 0, 1, 0], [], []>} : vector<64x8xf32>, vector<64x8xf32>, vector<64x64xf32> -> vector<64x64xf32>
    %cst_52 = arith.constant 0.353553385 : f32
    %159 = vector.broadcast %cst_52 : f32 to vector<64x64xf32>
    %160 = arith.mulf %158, %159 : vector<64x64xf32>
    %161 = arith.addf %160, %140 : vector<64x64xf32>
    %cst_53 = arith.constant dense<0xFF800000> : vector<64xf32>
    %162 = vector.multi_reduction <maximumf>, %161, %cst_53 [1] : vector<64x64xf32> to vector<64xf32>
    %163 = vector.shape_cast %162 : vector<64xf32> to vector<64x1xf32>
    %164 = vector.broadcast %163 : vector<64x1xf32> to vector<64x64xf32>
    %165 = arith.subf %161, %164 : vector<64x64xf32>
    %166 = math.exp %165 : vector<64x64xf32>
    %cst_54 = arith.constant dense<0.000000e+00> : vector<64xf32>
    %167 = vector.multi_reduction <add>, %166, %cst_54 [1] : vector<64x64xf32> to vector<64xf32>
    %168 = vector.shape_cast %167 : vector<64xf32> to vector<64x1xf32>
    %169 = tpu.reciprocal %168 {approx = true} : vector<64x1xf32> -> vector<64x1xf32>
    %170 = vector.broadcast %169 : vector<64x1xf32> to vector<64x64xf32>
    %171 = arith.mulf %166, %170 : vector<64x64xf32>
    %cst_55 = arith.constant dense<0.000000e+00> : vector<64x8xf32>
    %172 = tpu.matmul %171, %157, %cst_55 {dimension_numbers = #tpu.dot_dimension_numbers<[1], [0], [0], [1], [0, 0, 1, 1], [], []>} : vector<64x64xf32>, vector<64x8xf32>, vector<64x8xf32> -> vector<64x8xf32>
    %173 = vector.extract_strided_slice %172 {offsets = [0, 0], sizes = [16, 8], strides = [1, 1]} : vector<64x8xf32> to vector<16x8xf32>
    %174 = vector.extract_strided_slice %172 {offsets = [16, 0], sizes = [16, 8], strides = [1, 1]} : vector<64x8xf32> to vector<16x8xf32>
    %175 = vector.extract_strided_slice %172 {offsets = [32, 0], sizes = [16, 8], strides = [1, 1]} : vector<64x8xf32> to vector<16x8xf32>
    %176 = vector.extract_strided_slice %172 {offsets = [48, 0], sizes = [16, 8], strides = [1, 1]} : vector<64x8xf32> to vector<16x8xf32>
    %177 = tpu.concatenate %173, %174, %175, %176 in 1 : vector<16x8xf32>, vector<16x8xf32>, vector<16x8xf32>, vector<16x8xf32> -> vector<16x32xf32>
    %cst_56 = arith.constant dense<0.000000e+00> : vector<16x32xf32>
    %178 = tpu.matmul %177, %141, %cst_56 {dimension_numbers = #tpu.dot_dimension_numbers<[1], [0], [0], [1], [0, 0, 1, 1], [], []>} : vector<16x32xf32>, vector<32x32xf32>, vector<16x32xf32> -> vector<16x32xf32>
    %179 = vector.broadcast %142 : vector<1x32xf32> to vector<16x32xf32>
    %180 = arith.addf %178, %179 : vector<16x32xf32>
    %181 = arith.addf %131, %180 : vector<16x32xf32>
    %182 = vector.extract_strided_slice %0 {offsets = [10, 0], sizes = [1, 32], strides = [1, 1]} : vector<22x128xf32> to vector<1x32xf32>
    %183 = vector.extract_strided_slice %0 {offsets = [11, 0], sizes = [1, 32], strides = [1, 1]} : vector<22x128xf32> to vector<1x32xf32>
    %cst_57 = arith.constant dense<0.000000e+00> : vector<16xf32>
    %184 = vector.multi_reduction <add>, %181, %cst_57 [1] : vector<16x32xf32> to vector<16xf32>
    %185 = vector.shape_cast %184 : vector<16xf32> to vector<16x1xf32>
    %cst_58 = arith.constant 3.200000e+01 : f32
    %186 = vector.broadcast %cst_58 : f32 to vector<16x1xf32>
    %187 = arith.divf %185, %186 : vector<16x1xf32>
    %188 = vector.broadcast %187 : vector<16x1xf32> to vector<16x32xf32>
    %189 = arith.subf %181, %188 : vector<16x32xf32>
    %190 = arith.mulf %189, %189 : vector<16x32xf32>
    %cst_59 = arith.constant dense<0.000000e+00> : vector<16xf32>
    %191 = vector.multi_reduction <add>, %190, %cst_59 [1] : vector<16x32xf32> to vector<16xf32>
    %192 = vector.shape_cast %191 : vector<16xf32> to vector<16x1xf32>
    %cst_60 = arith.constant 3.200000e+01 : f32
    %193 = vector.broadcast %cst_60 : f32 to vector<16x1xf32>
    %194 = arith.divf %192, %193 : vector<16x1xf32>
    %195 = vector.broadcast %187 : vector<16x1xf32> to vector<16x32xf32>
    %196 = arith.subf %181, %195 : vector<16x32xf32>
    %cst_61 = arith.constant 9.99999974E-6 : f32
    %197 = vector.broadcast %cst_61 : f32 to vector<16x1xf32>
    %198 = arith.addf %194, %197 : vector<16x1xf32>
    %199 = math.rsqrt %198 : vector<16x1xf32>
    %200 = vector.broadcast %199 : vector<16x1xf32> to vector<16x32xf32>
    %201 = arith.mulf %196, %200 : vector<16x32xf32>
    %202 = vector.broadcast %182 : vector<1x32xf32> to vector<16x32xf32>
    %203 = arith.mulf %201, %202 : vector<16x32xf32>
    %204 = vector.broadcast %183 : vector<1x32xf32> to vector<16x32xf32>
    %205 = arith.addf %203, %204 : vector<16x32xf32>
    %c0_62 = arith.constant 0 : index
    %c0_63 = arith.constant 0 : index
    %206 = vector.load %arg15[%c0_62, %c0_63] : memref<32x32xf32, #tpu.memory_space<vmem>>, vector<32x32xf32>
    %cst_64 = arith.constant dense<0.000000e+00> : vector<16x32xf32>
    %207 = tpu.matmul %205, %206, %cst_64 {dimension_numbers = #tpu.dot_dimension_numbers<[1], [0], [0], [1], [0, 0, 1, 1], [], []>} : vector<16x32xf32>, vector<32x32xf32>, vector<16x32xf32> -> vector<16x32xf32>
    %208 = vector.extract_strided_slice %0 {offsets = [12, 0], sizes = [1, 32], strides = [1, 1]} : vector<22x128xf32> to vector<1x32xf32>
    %209 = vector.broadcast %208 : vector<1x32xf32> to vector<16x32xf32>
    %210 = arith.addf %207, %209 : vector<16x32xf32>
    %c0_65 = arith.constant 0 : index
    %c0_66 = arith.constant 0 : index
    %211 = vector.load %arg16[%c0_65, %c0_66] : memref<32x64xf32, #tpu.memory_space<vmem>>, vector<32x64xf32>
    %cst_67 = arith.constant dense<0.000000e+00> : vector<16x64xf32>
    %212 = tpu.matmul %121, %211, %cst_67 {dimension_numbers = #tpu.dot_dimension_numbers<[1], [0], [0], [1], [0, 0, 1, 1], [], []>} : vector<16x32xf32>, vector<32x64xf32>, vector<16x64xf32> -> vector<16x64xf32>
    %213 = vector.extract_strided_slice %0 {offsets = [13, 0], sizes = [1, 64], strides = [1, 1]} : vector<22x128xf32> to vector<1x64xf32>
    %214 = vector.broadcast %213 : vector<1x64xf32> to vector<16x64xf32>
    %215 = arith.addf %212, %214 : vector<16x64xf32>
    %216 = vector.extract_strided_slice %215 {offsets = [0, 0], sizes = [16, 32], strides = [1, 1]} : vector<16x64xf32> to vector<16x32xf32>
    %217 = vector.extract_strided_slice %215 {offsets = [0, 32], sizes = [16, 32], strides = [1, 1]} : vector<16x64xf32> to vector<16x32xf32>
    %c0_68 = arith.constant 0 : index
    %c0_69 = arith.constant 0 : index
    %218 = vector.load %arg8[%c0_68, %c0_69] : memref<64x64xf32, #tpu.memory_space<vmem>>, vector<64x64xf32>
    %c0_70 = arith.constant 0 : index
    %c0_71 = arith.constant 0 : index
    %219 = vector.load %arg17[%c0_70, %c0_71] : memref<32x32xf32, #tpu.memory_space<vmem>>, vector<32x32xf32>
    %220 = vector.extract_strided_slice %0 {offsets = [14, 0], sizes = [1, 32], strides = [1, 1]} : vector<22x128xf32> to vector<1x32xf32>
    %221 = vector.extract_strided_slice %210 {offsets = [0, 0], sizes = [16, 8], strides = [1, 1]} : vector<16x32xf32> to vector<16x8xf32>
    %222 = vector.extract_strided_slice %210 {offsets = [0, 8], sizes = [16, 8], strides = [1, 1]} : vector<16x32xf32> to vector<16x8xf32>
    %223 = vector.extract_strided_slice %210 {offsets = [0, 16], sizes = [16, 8], strides = [1, 1]} : vector<16x32xf32> to vector<16x8xf32>
    %224 = vector.extract_strided_slice %210 {offsets = [0, 24], sizes = [16, 8], strides = [1, 1]} : vector<16x32xf32> to vector<16x8xf32>
    %225 = tpu.concatenate %221, %222, %223, %224 in 0 : vector<16x8xf32>, vector<16x8xf32>, vector<16x8xf32>, vector<16x8xf32> -> vector<64x8xf32>
    %226 = vector.extract_strided_slice %216 {offsets = [0, 0], sizes = [16, 8], strides = [1, 1]} : vector<16x32xf32> to vector<16x8xf32>
    %227 = vector.extract_strided_slice %216 {offsets = [0, 8], sizes = [16, 8], strides = [1, 1]} : vector<16x32xf32> to vector<16x8xf32>
    %228 = vector.extract_strided_slice %216 {offsets = [0, 16], sizes = [16, 8], strides = [1, 1]} : vector<16x32xf32> to vector<16x8xf32>
    %229 = vector.extract_strided_slice %216 {offsets = [0, 24], sizes = [16, 8], strides = [1, 1]} : vector<16x32xf32> to vector<16x8xf32>
    %230 = tpu.concatenate %226, %227, %228, %229 in 0 : vector<16x8xf32>, vector<16x8xf32>, vector<16x8xf32>, vector<16x8xf32> -> vector<64x8xf32>
    %231 = vector.extract_strided_slice %217 {offsets = [0, 0], sizes = [16, 8], strides = [1, 1]} : vector<16x32xf32> to vector<16x8xf32>
    %232 = vector.extract_strided_slice %217 {offsets = [0, 8], sizes = [16, 8], strides = [1, 1]} : vector<16x32xf32> to vector<16x8xf32>
    %233 = vector.extract_strided_slice %217 {offsets = [0, 16], sizes = [16, 8], strides = [1, 1]} : vector<16x32xf32> to vector<16x8xf32>
    %234 = vector.extract_strided_slice %217 {offsets = [0, 24], sizes = [16, 8], strides = [1, 1]} : vector<16x32xf32> to vector<16x8xf32>
    %235 = tpu.concatenate %231, %232, %233, %234 in 0 : vector<16x8xf32>, vector<16x8xf32>, vector<16x8xf32>, vector<16x8xf32> -> vector<64x8xf32>
    %cst_72 = arith.constant dense<0.000000e+00> : vector<64x64xf32>
    %236 = tpu.matmul %225, %230, %cst_72 {dimension_numbers = #tpu.dot_dimension_numbers<[1], [1], [0], [0], [0, 0, 1, 0], [], []>} : vector<64x8xf32>, vector<64x8xf32>, vector<64x64xf32> -> vector<64x64xf32>
    %cst_73 = arith.constant 0.353553385 : f32
    %237 = vector.broadcast %cst_73 : f32 to vector<64x64xf32>
    %238 = arith.mulf %236, %237 : vector<64x64xf32>
    %239 = arith.addf %238, %218 : vector<64x64xf32>
    %cst_74 = arith.constant dense<0xFF800000> : vector<64xf32>
    %240 = vector.multi_reduction <maximumf>, %239, %cst_74 [1] : vector<64x64xf32> to vector<64xf32>
    %241 = vector.shape_cast %240 : vector<64xf32> to vector<64x1xf32>
    %242 = vector.broadcast %241 : vector<64x1xf32> to vector<64x64xf32>
    %243 = arith.subf %239, %242 : vector<64x64xf32>
    %244 = math.exp %243 : vector<64x64xf32>
    %cst_75 = arith.constant dense<0.000000e+00> : vector<64xf32>
    %245 = vector.multi_reduction <add>, %244, %cst_75 [1] : vector<64x64xf32> to vector<64xf32>
    %246 = vector.shape_cast %245 : vector<64xf32> to vector<64x1xf32>
    %247 = tpu.reciprocal %246 {approx = true} : vector<64x1xf32> -> vector<64x1xf32>
    %248 = vector.broadcast %247 : vector<64x1xf32> to vector<64x64xf32>
    %249 = arith.mulf %244, %248 : vector<64x64xf32>
    %cst_76 = arith.constant dense<0.000000e+00> : vector<64x8xf32>
    %250 = tpu.matmul %249, %235, %cst_76 {dimension_numbers = #tpu.dot_dimension_numbers<[1], [0], [0], [1], [0, 0, 1, 1], [], []>} : vector<64x64xf32>, vector<64x8xf32>, vector<64x8xf32> -> vector<64x8xf32>
    %251 = vector.extract_strided_slice %250 {offsets = [0, 0], sizes = [16, 8], strides = [1, 1]} : vector<64x8xf32> to vector<16x8xf32>
    %252 = vector.extract_strided_slice %250 {offsets = [16, 0], sizes = [16, 8], strides = [1, 1]} : vector<64x8xf32> to vector<16x8xf32>
    %253 = vector.extract_strided_slice %250 {offsets = [32, 0], sizes = [16, 8], strides = [1, 1]} : vector<64x8xf32> to vector<16x8xf32>
    %254 = vector.extract_strided_slice %250 {offsets = [48, 0], sizes = [16, 8], strides = [1, 1]} : vector<64x8xf32> to vector<16x8xf32>
    %255 = tpu.concatenate %251, %252, %253, %254 in 1 : vector<16x8xf32>, vector<16x8xf32>, vector<16x8xf32>, vector<16x8xf32> -> vector<16x32xf32>
    %cst_77 = arith.constant dense<0.000000e+00> : vector<16x32xf32>
    %256 = tpu.matmul %255, %219, %cst_77 {dimension_numbers = #tpu.dot_dimension_numbers<[1], [0], [0], [1], [0, 0, 1, 1], [], []>} : vector<16x32xf32>, vector<32x32xf32>, vector<16x32xf32> -> vector<16x32xf32>
    %257 = vector.broadcast %220 : vector<1x32xf32> to vector<16x32xf32>
    %258 = arith.addf %256, %257 : vector<16x32xf32>
    %259 = arith.addf %205, %258 : vector<16x32xf32>
    %260 = vector.extract_strided_slice %0 {offsets = [15, 0], sizes = [1, 32], strides = [1, 1]} : vector<22x128xf32> to vector<1x32xf32>
    %261 = vector.extract_strided_slice %0 {offsets = [16, 0], sizes = [1, 32], strides = [1, 1]} : vector<22x128xf32> to vector<1x32xf32>
    %cst_78 = arith.constant dense<0.000000e+00> : vector<16xf32>
    %262 = vector.multi_reduction <add>, %259, %cst_78 [1] : vector<16x32xf32> to vector<16xf32>
    %263 = vector.shape_cast %262 : vector<16xf32> to vector<16x1xf32>
    %cst_79 = arith.constant 3.200000e+01 : f32
    %264 = vector.broadcast %cst_79 : f32 to vector<16x1xf32>
    %265 = arith.divf %263, %264 : vector<16x1xf32>
    %266 = vector.broadcast %265 : vector<16x1xf32> to vector<16x32xf32>
    %267 = arith.subf %259, %266 : vector<16x32xf32>
    %268 = arith.mulf %267, %267 : vector<16x32xf32>
    %cst_80 = arith.constant dense<0.000000e+00> : vector<16xf32>
    %269 = vector.multi_reduction <add>, %268, %cst_80 [1] : vector<16x32xf32> to vector<16xf32>
    %270 = vector.shape_cast %269 : vector<16xf32> to vector<16x1xf32>
    %cst_81 = arith.constant 3.200000e+01 : f32
    %271 = vector.broadcast %cst_81 : f32 to vector<16x1xf32>
    %272 = arith.divf %270, %271 : vector<16x1xf32>
    %273 = vector.broadcast %265 : vector<16x1xf32> to vector<16x32xf32>
    %274 = arith.subf %259, %273 : vector<16x32xf32>
    %cst_82 = arith.constant 9.99999974E-6 : f32
    %275 = vector.broadcast %cst_82 : f32 to vector<16x1xf32>
    %276 = arith.addf %272, %275 : vector<16x1xf32>
    %277 = math.rsqrt %276 : vector<16x1xf32>
    %278 = vector.broadcast %277 : vector<16x1xf32> to vector<16x32xf32>
    %279 = arith.mulf %274, %278 : vector<16x32xf32>
    %280 = vector.broadcast %260 : vector<1x32xf32> to vector<16x32xf32>
    %281 = arith.mulf %279, %280 : vector<16x32xf32>
    %282 = vector.broadcast %261 : vector<1x32xf32> to vector<16x32xf32>
    %283 = arith.addf %281, %282 : vector<16x32xf32>
    %c0_83 = arith.constant 0 : index
    %c0_84 = arith.constant 0 : index
    %284 = vector.load %arg18[%c0_83, %c0_84] : memref<32x64xf32, #tpu.memory_space<vmem>>, vector<32x64xf32>
    %cst_85 = arith.constant dense<0.000000e+00> : vector<16x64xf32>
    %285 = tpu.matmul %283, %284, %cst_85 {dimension_numbers = #tpu.dot_dimension_numbers<[1], [0], [0], [1], [0, 0, 1, 1], [], []>} : vector<16x32xf32>, vector<32x64xf32>, vector<16x64xf32> -> vector<16x64xf32>
    %286 = vector.extract_strided_slice %0 {offsets = [17, 0], sizes = [1, 64], strides = [1, 1]} : vector<22x128xf32> to vector<1x64xf32>
    %287 = vector.broadcast %286 : vector<1x64xf32> to vector<16x64xf32>
    %288 = arith.addf %285, %287 : vector<16x64xf32>
    %cst_86 = arith.constant 0.000000e+00 : f32
    %289 = vector.broadcast %cst_86 : f32 to vector<16x64xf32>
    %290 = arith.maximumf %288, %289 : vector<16x64xf32>
    %c0_87 = arith.constant 0 : index
    %c0_88 = arith.constant 0 : index
    %291 = vector.load %arg19[%c0_87, %c0_88] : memref<64x32xf32, #tpu.memory_space<vmem>>, vector<64x32xf32>
    %cst_89 = arith.constant dense<0.000000e+00> : vector<16x32xf32>
    %292 = tpu.matmul %290, %291, %cst_89 {dimension_numbers = #tpu.dot_dimension_numbers<[1], [0], [0], [1], [0, 0, 1, 1], [], []>} : vector<16x64xf32>, vector<64x32xf32>, vector<16x32xf32> -> vector<16x32xf32>
    %293 = vector.extract_strided_slice %0 {offsets = [18, 0], sizes = [1, 32], strides = [1, 1]} : vector<22x128xf32> to vector<1x32xf32>
    %294 = vector.broadcast %293 : vector<1x32xf32> to vector<16x32xf32>
    %295 = arith.addf %292, %294 : vector<16x32xf32>
    %296 = arith.addf %283, %295 : vector<16x32xf32>
    %297 = vector.extract_strided_slice %0 {offsets = [19, 0], sizes = [1, 32], strides = [1, 1]} : vector<22x128xf32> to vector<1x32xf32>
    %298 = vector.extract_strided_slice %0 {offsets = [20, 0], sizes = [1, 32], strides = [1, 1]} : vector<22x128xf32> to vector<1x32xf32>
    %cst_90 = arith.constant dense<0.000000e+00> : vector<16xf32>
    %299 = vector.multi_reduction <add>, %296, %cst_90 [1] : vector<16x32xf32> to vector<16xf32>
    %300 = vector.shape_cast %299 : vector<16xf32> to vector<16x1xf32>
    %cst_91 = arith.constant 3.200000e+01 : f32
    %301 = vector.broadcast %cst_91 : f32 to vector<16x1xf32>
    %302 = arith.divf %300, %301 : vector<16x1xf32>
    %303 = vector.broadcast %302 : vector<16x1xf32> to vector<16x32xf32>
    %304 = arith.subf %296, %303 : vector<16x32xf32>
    %305 = arith.mulf %304, %304 : vector<16x32xf32>
    %cst_92 = arith.constant dense<0.000000e+00> : vector<16xf32>
    %306 = vector.multi_reduction <add>, %305, %cst_92 [1] : vector<16x32xf32> to vector<16xf32>
    %307 = vector.shape_cast %306 : vector<16xf32> to vector<16x1xf32>
    %cst_93 = arith.constant 3.200000e+01 : f32
    %308 = vector.broadcast %cst_93 : f32 to vector<16x1xf32>
    %309 = arith.divf %307, %308 : vector<16x1xf32>
    %310 = vector.broadcast %302 : vector<16x1xf32> to vector<16x32xf32>
    %311 = arith.subf %296, %310 : vector<16x32xf32>
    %cst_94 = arith.constant 9.99999974E-6 : f32
    %312 = vector.broadcast %cst_94 : f32 to vector<16x1xf32>
    %313 = arith.addf %309, %312 : vector<16x1xf32>
    %314 = math.rsqrt %313 : vector<16x1xf32>
    %315 = vector.broadcast %314 : vector<16x1xf32> to vector<16x32xf32>
    %316 = arith.mulf %311, %315 : vector<16x32xf32>
    %317 = vector.broadcast %297 : vector<1x32xf32> to vector<16x32xf32>
    %318 = arith.mulf %316, %317 : vector<16x32xf32>
    %319 = vector.broadcast %298 : vector<1x32xf32> to vector<16x32xf32>
    %320 = arith.addf %318, %319 : vector<16x32xf32>
    %c0_95 = arith.constant 0 : index
    %c0_96 = arith.constant 0 : index
    %321 = vector.load %arg20[%c0_95, %c0_96] : memref<32x128xf32, #tpu.memory_space<vmem>>, vector<32x128xf32>
    %cst_97 = arith.constant dense<0.000000e+00> : vector<16x128xf32>
    %322 = tpu.matmul %320, %321, %cst_97 {dimension_numbers = #tpu.dot_dimension_numbers<[1], [0], [0], [1], [0, 0, 1, 1], [], []>} : vector<16x32xf32>, vector<32x128xf32>, vector<16x128xf32> -> vector<16x128xf32>
    %323 = vector.extract_strided_slice %0 {offsets = [21, 0], sizes = [1, 128], strides = [1, 1]} : vector<22x128xf32> to vector<1x128xf32>
    %324 = vector.broadcast %323 : vector<1x128xf32> to vector<16x128xf32>
    %325 = arith.addf %322, %324 : vector<16x128xf32>
    %c0_98 = arith.constant 0 : index
    %c0_99 = arith.constant 0 : index
    %326 = vector.load %arg22[%c0_98, %c0_99] : memref<16x128xf32, #tpu.memory_space<vmem>>, vector<16x128xf32>
    tpu.vector_store %arg22[%c0_98, %c0_99], %325 {strides = array<i32>} : memref<16x128xf32, #tpu.memory_space<vmem>>, vector<16x128xf32>,
    return
  }
}

</mosaic_0001>

<bundles_post_ra>
// kernel: transformer_seq2seq.1
= control target key start
LH: loop header
LB: loop body
LE: loop exit
PB: predicated region body
PF: predicated region fallthrough
CT: control target
= control target key end

     0   :  { %s3497_s0 = inlined_call_operand.vmem [shape: s32[16,1], index: 0, kind: input, shape index: {}]   ;;  %s3498_s1 = inlined_call_operand.vmem [shape: s32[16,1], index: 1, kind: input, shape index: {}]   ;;  %s3499_s2 = inlined_call_operand.vmem [shape: f32[128,32], index: 2, kind: input, shape index: {}]   ;;  %s3500_s3 = inlined_call_operand.vmem [shape: f32[128,32], index: 3, kind: input, shape index: {}]   ;;  %s3501_s4 = inlined_call_operand.hbm [shape: f32[16,32], index: 4, kind: input, shape index: {}, may-alias: {4,5}]   ;;  %s3502_s5 = inlined_call_operand.hbm [shape: f32[16,32], index: 5, kind: input, shape index: {}, may-alias: {4,5}]   ;;  %s3503_s6 = inlined_call_operand.vmem [shape: f32[64,64], index: 6, kind: input, shape index: {}, may-alias: {6,8}]   ;;  %s3504_s7 = inlined_call_operand.vmem [shape: f32[64,64], index: 7, kind: input, shape index: {}]   ;;  %s3505_s8 = inlined_call_operand.vmem [shape: f32[64,64], index: 8, kind: input, shape index: {}, may-alias: {6,8}]   ;;  %s3506_s9 = inlined_call_operand.vmem [shape: f32[32,96], index: 9, kind: input, shape index: {}]   ;;  %s3507_s10 = inlined_call_operand.vmem [shape: f32[32,32], index: 10, kind: input, shape index: {}]   ;;  %s3508_s11 = inlined_call_operand.vmem [shape: f32[32,64], index: 11, kind: input, shape index: {}]   ;;  %s3509_s12 = inlined_call_operand.vmem [shape: f32[64,32], index: 12, kind: input, shape index: {}]   ;;  %s3510_s13 = inlined_call_operand.vmem [shape: f32[32,96], index: 13, kind: input, shape index: {}]   ;;  %s3511_s14 = inlined_call_operand.vmem [shape: f32[32,32], index: 14, kind: input, shape index: {}]   ;;  %s3512_s15 = inlined_call_operand.vmem [shape: f32[32,32], index: 15, kind: input, shape index: {}]   ;;  %s3513_s16 = inlined_call_operand.vmem [shape: f32[32,64], index: 16, kind: input, shape index: {}]   ;;  %s3514_s17 = inlined_call_operand.vmem [shape: f32[32,32], index: 17, kind: input, shape index: {}]   ;;  %s3515_s18 = inlined_call_operand.vmem [shape: f32[32,64], index: 18, kind: input, shape index: {}]   ;;  %s3516_s19 = inlined_call_operand.vmem [shape: f32[64,32], index: 19, kind: input, shape index: {}]   ;;  %s3517_s20 = inlined_call_operand.hbm [shape: f32[32,128], index: 20, kind: input, shape index: {}]   ;;  %s3518_s21 = inlined_call_operand.hbm [shape: f32[22,128], index: 21, kind: input, shape index: {}]   ;;  %s3519_s22 = inlined_call_operand.hbm [shape: f32[16,128], index: 22, kind: output, shape index: {}]  }
   0x1   :  { %3526 = sst [smem:[#allocation15_spill]] %s3497_s0 }
   0x2   :  { %3527 = sst [smem:[#allocation16_spill]] %s3498_s1 }
   0x3   :  { %3528 = sst [smem:[#allocation17_spill]] %s3499_s2 }
   0x4   :  { %3529 = sst [smem:[#allocation18_spill]] %s3500_s3 }
   0x5   :  { %3530 = sst [smem:[#allocation19_spill]] %s3501_s4 }
   0x6   :  { %3531 = sst [smem:[#allocation20_spill]] %s3502_s5 }
   0x7   :  { %3532 = sst [smem:[#allocation21_spill]] %s3503_s6 }
   0x8   :  { %27 = vsyncpa [#allocation3], 0 }
   0x9   :  { %28 = vsyncpa [#allocation6], 0 }
   0xa   :  { %29 = vsyncpa [#allocation9], 0 }
   0xb   :  { %30 = vsyncpa [#allocation4], 0  ;;  %s3533_s29 = sld [smem:[#allocation20_spill]]  ;;  %s2404_s4 = smov [#allocation5]  }
   0xc   :  { %s58_s0 = sshll.u32 %s2404_s4, 4  ;;  %s3534_s5 = sld [smem:[#allocation19_spill]]  ;;  %s59_s0 = int_to_ptr.vmem [resolvable:$true] %s58_s0 }
   0xd   :  { %s3525_s6 = smov 128   ;;  %s2406_s25 = smov 8  }
   0xe   :  { %s2407_s26 = smov [#allocation2]   ;;  %s97_s28 = sshll.u32 %s3517_s20, 4  ;;  %s98_s28 = int_to_ptr.hbm [resolvable:$true] %s97_s28 }
   0xf   :  { %s45_s2 = sshll.u32 %s2407_s26, 4  ;;  %s110_s23 = sshll.u32 %s3518_s21, 4  ;;  %s46_s2 = int_to_ptr.vmem [resolvable:$true] %s45_s2  ;;  %s111_s23 = int_to_ptr.hbm [resolvable:$true] %s110_s23 }
  0x10   :  { %s2408_s1 = smov [#allocation7]  }
  0x11   :  { %s56_s30 = sshll.u32 %s3533_s29, 4  ;;  %s57_s30 = int_to_ptr.hbm [resolvable:$true] %s56_s30 }
  0x12   :  { %s43_s24 = sshll.u32 %s3534_s5, 4  ;;  %s99_s5 = sshll.u32 %s2408_s1, 4  ;;  %s44_s24 = int_to_ptr.hbm [resolvable:$true] %s43_s24  ;;  %s100_s5 = int_to_ptr.vmem [resolvable:$true] %s99_s5 }
  0x13   :  { %64 = dma.hbm_to_vmem [thread:$0]  %s57_s30, 256, %s59_s0, [#allocation6], %s3525_s6, %s3525_s6, %s2406_s25  }
  0x14   :  { %51 = dma.hbm_to_vmem [thread:$0]  %s44_s24, 256, %s46_s2, [#allocation3], %s3525_s6, %s3525_s6, %s2406_s25  }
  0x15   :  { %105 = dma.hbm_to_vmem [thread:$0]  %s98_s28, 512, %s100_s5, [#allocation6], %s3525_s6, %s3525_s6, %s2406_s25  }
  0x16   :  { %s2409_s30 = smov [#allocation8]  }
  0x17   :  { %s112_s20 = sshll.u32 %s2409_s30, 4  ;;  %s113_s20 = int_to_ptr.vmem [resolvable:$true] %s112_s20 }
  0x18   :  { %118 = dma.hbm_to_vmem [thread:$0]  %s111_s23, 384, %s113_s20, [#allocation9], %s3525_s6, %s3525_s6, %s2406_s25  }
  0x19   :  { %2396 = dma.done.wait [#allocation3], 256  }
  0x1a   :  { %2397 = vsyncadd [#allocation3], 4294967040 }
  0x1b   :  { %2398 = dma.done.wait [#allocation6], 768  }
  0x1c   :  { %2399 = vsyncadd [#allocation6], 4294966528 }
  0x1d   :  { %2400 = dma.done.wait [#allocation9], 384  }
  0x1e   :  { %2401 = vsyncadd [#allocation9], 4294966912  ;;  %v2410_v0 = vmov 0   ;;  %s3535_s24 = sld [smem:[#allocation15_spill]]  ;;  %v198_v19 = vld [vmem:[%s3506_s9 + $0x18] sm:$0xff]  ;;  %v197_v20 = vld [vmem:[%s3506_s9 + $0x10] sm:$0xff]  ;;  %v138_v21 = vlaneseq }
  0x1f   :  { %2094 = vset.pattern.permute.xlu0 %v2410_v0  ;;  %2115 = vset.pattern.permute.xlu2 %v2410_v0  ;;  %s3536_s27 = sld [smem:[#allocation17_spill]]  ;;  %v2411_v24 = vmov 1.0   ;;  %v196_v26 = vld [vmem:[%s3506_s9 + $0x8] sm:$0xff]  ;;  %v195_v27 = vld [vmem:[%s3506_s9] sm:$0xff]  ;;  %vm200_vm2 = vcmask 261120   ;;  %s2412_s9 = smov 120  }
  0x20   :  { %219 = vmatpush.msra.mxu1 %v198_v19  ;;  %v2620_v22 = vand.u32 127, %v138_v21  ;;  %v170_v28 = vld [vmem:[#allocation2] sm:$0xff]  ;;  %v171_v31 = vld [vmem:[#allocation2 + $0x8] sm:$0xff]  ;;  %s2413_s26 = smov 112   ;;  %s2414_s2 = smov 104   ;;  %vm272_vm3 = vcmask 64512  }
  0x21   :  { %v2640_v35 = vld [vmem:[#allocation8] sm:$0xff]  ;;  %s2415_s3 = smov 96   ;;  %vm362_vm4 = vcmask 523264   ;;  %s2416_s20 = smov 64   ;;  %vm566_vm5 = vcmask 130048   ;;  %vm569_vm6 = vcmask 195584  }
  0x22   :  { %220 = vmatpush.msra.mxu1 %v197_v20  ;;  %v199_v36 = vperm.slane %v2640_v35, 0  ;;  %s2418_s30 = smov 24   ;;  %s3539_s0 = sld [smem:[#allocation18_spill]] }
  0x24   :  { %v140_v1 = vld [vmem:[%s3535_s24] sm:$0xff]  ;;  %v141_v6 = vld [vmem:[%s3535_s24 + $0x8] sm:$0xff]  ;;  %221 = vmatpush.msra.mxu1 %v196_v26  ;;  %s3537_s24 = sld [smem:[#allocation21_spill]] }
  0x25   :  { %v169_v2 = vld [vmem:[%s3536_s27 + $0x78] sm:$0xff]  ;;  %143 = vperm.xlu0 %2094, %v140_v1   ;;  %v168_v3 = vld [vmem:[%s3536_s27 + $0x70] sm:$0xff]  ;;  %v167_v4 = vld [vmem:[%s3536_s27 + $0x68] sm:$0xff] }
  0x26   :  { %172 = vmatpush.msra.mxu0 %v169_v2  ;;  %v166_v5 = vld [vmem:[%s3536_s27 + $0x60] sm:$0xff]  ;;  %v165_v7 = vld [vmem:[%s3536_s27 + $0x58] sm:$0xff]  ;;  %v164_v8 = vld [vmem:[%s3536_s27 + $0x50] sm:$0xff]  ;;  %222 = vmatpush.msra.mxu1 %v195_v27 }
  0x27   :  { %v163_v9 = vld [vmem:[%s3536_s27 + $0x48] sm:$0xff]  ;;  %v162_v10 = vld [vmem:[%s3536_s27 + $0x40] sm:$0xff]  ;;  %v161_v11 = vld [vmem:[%s3536_s27 + $0x38] sm:$0xff] }
  0x28   :  { %173 = vmatpush.msra.mxu0 %v168_v3  ;;  %v160_v12 = vld [vmem:[%s3536_s27 + $0x30] sm:$0xff]  ;;  %v159_v13 = vld [vmem:[%s3536_s27 + $0x28] sm:$0xff]  ;;  %v158_v14 = vld [vmem:[%s3536_s27 + $0x20] sm:$0xff] }
  0x29   :  { %v157_v15 = vld [vmem:[%s3536_s27 + $0x18] sm:$0xff]  ;;  %v156_v16 = vld [vmem:[%s3536_s27 + $0x10] sm:$0xff]  ;;  %v155_v17 = vld [vmem:[%s3536_s27 + $0x8] sm:$0xff] }
  0x2a   :  { %174 = vmatpush.msra.mxu0 %v167_v4  ;;  %v154_v18 = vld [vmem:[%s3536_s27] sm:$0xff]  ;;  %v231_v60 = vld [vmem:[%s3537_s24 + $0x8] sm:$0xff]  ;;  %v232_v1 = vld [vmem:[%s3537_s24 + $0x10] sm:$0xff]  ;;  %s3538_s27 = sld [smem:[#allocation16_spill]] }
  0x2b   :  { %v230_v55 = vld [vmem:[%s3537_s24] sm:$0xff]  ;;  %v233_v20 = vld [vmem:[%s3537_s24 + $0x18] sm:$0xff] }
  0x2c   :  { %175 = vmatpush.msra.mxu0 %v166_v5  ;;  %v237_v26 = vld [vmem:[%s3537_s24 + $0x38] sm:$0xff] }
  0x2d   :  { %146 = vperm.xlu0 %2094, %v141_v6  }
  0x2e   :  { %176 = vmatpush.msra.mxu0 %v165_v7  ;;  %v234_v7 = vld [vmem:[%s3537_s24 + $0x20] sm:$0xff] }
  0x30   :  { %177 = vmatpush.msra.mxu0 %v164_v8 }
  0x32   :  { %178 = vmatpush.msra.mxu0 %v163_v9 }
  0x34   :  { %179 = vmatpush.msra.mxu0 %v162_v10 }
  0x36   :  { %180 = vmatpush.msra.mxu0 %v161_v11 }
  0x38   :  { %181 = vmatpush.msra.mxu0 %v160_v12 }
  0x3a   :  { %182 = vmatpush.msra.mxu0 %v159_v13 }
  0x3c   :  { %183 = vmatpush.msra.mxu0 %v158_v14 }
  0x3e   :  { %184 = vmatpush.msra.mxu0 %v157_v15  ;;  %v236_v15 = vld [vmem:[%s3537_s24 + $0x30] sm:$0xff] }
  0x40   :  { %185 = vmatpush.msra.mxu0 %v156_v16 }
  0x42   :  { %186 = vmatpush.msra.mxu0 %v155_v17 }
  0x44   :  { %187 = vmatpush.msra.mxu0 %v154_v18 }
  0x97   :  { %v144_v23 = vpop.permute.xlu0 %143 }
  0x98   :  { %vm148_vm0 = vcmp.eq.s32.totalorder %v2620_v22, %v144_v23 }
  0x99   :  { %1967 = vmatmul.msk.f32.vlgmr.msra.gmra.mxu0 %vm148_vm0, %v2411_v24 }
  0x9f   :  { %v147_v25 = vpop.permute.xlu0 %146 }
  0xa0   :  { %vm149_vm1 = vcmp.eq.s32.totalorder %v2620_v22, %v147_v25 }
  0xa1   :  { %1968 = vmatmul.msk.f32.gmra.mxu0 %vm149_vm1, %v2411_v24 }
 0x116   :  { %v189_v29 = vpop.f32.mrf.mxu0 }
 0x117   :  { %v2632_v30 = vadd.f32 %v189_v29, %v170_v28 }
 0x119   :  { %1969 = vmatmul.msk.f32.vlgmr.msra.gmra.mxu1 %vm200_vm2, %v2632_v30 }
 0x11e   :  { %v192_v32 = vpop.f32.mrf.mxu0 }
 0x11f   :  { %v2636_v33 = vadd.f32 %v192_v32, %v171_v31  ;;  %v235_v31 = vld [vmem:[%s3537_s24 + $0x28] sm:$0xff]  ;;  %s2417_s24 = smov 16  }
 0x121   :  { %1970 = vmatmul.msk.f32.gmra.mxu1 %vm200_vm2, %v2636_v33 }
 0x196   :  { %v224_v34 = vpop.f32.mrf.mxu1 }
 0x197   :  { %v2651_v39 = vadd.f32 %v224_v34, %v199_v36 }
 0x19e   :  { %v227_v37 = vpop.f32.mrf.mxu1 }
 0x19f   :  { %v2643_v38 = vadd.f32 %v227_v37, %v199_v36 }
 0x1a1   :  { %246 = vrot.lane.b32.xlu0 %v2643_v38, %s2412_s9  ;;  %250 = vrot.lane.b32.xlu2 %v2643_v38, %s2413_s26  ;;  %v2110_v37 = vpack.i.bf16 %v2651_v39, %v2643_v38 }
 0x1a2   :  { %254 = vrot.lane.b32.xlu1 %v2643_v38, %s2414_s2 }
 0x1a9   :  { %248 = vrot.lane.b32.xlu2 %v2651_v39, %s2413_s26 }
 0x1aa   :  { %252 = vrot.lane.b32.xlu1 %v2651_v39, %s2414_s2 }
 0x1b2   :  { %244 = vrot.lane.b32.xlu1 %v2651_v39, %s2412_s9 }
 0x1fb   :  { %v2659_v40 = vpop.permute.xlu2 %250 }
 0x1fc   :  { %266 = vrot.lane.b32.xlu1 %v2659_v40, %s2415_s3 }
 0x203   :  { %v249_v42 = vpop.permute.xlu2 %248 }
 0x204   :  { %v2100_v10 = vpack.i.bf16 %v249_v42, %v2659_v40 }
 0x213   :  { %v2672_v44 = vpop.permute.xlu0 %246 }
 0x214   :  { %v2663_v41 = vpop.permute.xlu1 %254 }
 0x215   :  { %270 = vrot.lane.b32.xlu2 %v2663_v41, %s2415_s3 }
 0x21c   :  { %v2667_v43 = vpop.permute.xlu1 %252 }
 0x21d   :  { %264 = vrot.lane.b32.xlu2 %v249_v42, %s2415_s3  ;;  %268 = vrot.lane.b32.xlu0 %v2667_v43, %s2415_s3  ;;  %v2095_v12 = vpack.i.bf16 %v2667_v43, %v2663_v41 }
 0x224   :  { %v2674_v45 = vpop.permute.xlu1 %244 }
 0x225   :  { %258 = vrot.lane.b32.xlu2 %v2643_v38, %s2415_s3  ;;  %262 = vrot.lane.b32.xlu0 %v2672_v44, %s2415_s3 }
 0x226   :  { %260 = vrot.lane.b32.xlu1 %v2674_v45, %s2415_s3 }
 0x22d   :  { %256 = vrot.lane.b32.xlu0 %v2651_v39, %s2415_s3 }
 0x26e   :  { %v267_v48 = vpop.permute.xlu1 %266 }
 0x26f   :  { %v271_v46 = vpop.permute.xlu2 %270 }
 0x270   :  { %1971 = vmatpush.xpose.msk.msra.mxu2 %vm272_vm3, %v271_v46 }
 0x277   :  { %v265_v49 = vpop.permute.xlu2 %264 }
 0x27f   :  { %v259_v52 = vpop.permute.xlu2 %258 }
 0x28f   :  { %v269_v47 = vpop.permute.xlu0 %268 }
 0x290   :  { %1972 = vmatpush.xpose.msk.msra.mxu2 %vm272_vm3, %v269_v47 }
 0x294   :  { %1973 = vmatpush.xpose.msk.msra.mxu2 %vm272_vm3, %v267_v48 }
 0x297   :  { %v263_v50 = vpop.permute.xlu0 %262 }
 0x298   :  { %1974 = vmatpush.xpose.msk.msra.mxu2 %vm272_vm3, %v265_v49  ;;  %v261_v51 = vpop.permute.xlu1 %260 }
 0x29c   :  { %1975 = vmatpush.xpose.msk.msra.mxu2 %vm272_vm3, %v263_v50 }
 0x29f   :  { %v257_v53 = vpop.permute.xlu0 %256 }
 0x2a0   :  { %1976 = vmatpush.xpose.msk.msra.mxu2 %vm272_vm3, %v261_v51 }
 0x2a4   :  { %1977 = vmatpush.xpose.msk.msra.mxu2 %vm272_vm3, %v259_v52  ;;  %v2105_v52 = vpack.i.bf16 %v2674_v45, %v2672_v44 }
 0x2a8   :  { %1978 = vmatpush.xpose.msk.msra.mxu2 %vm272_vm3, %v257_v53 }
 0x2ab   :  { %1979 = vmatmul.msk.f32.vlgmr.msra.gmra.mxu2 %vm272_vm3, %v2651_v39 }
 0x2b3   :  { %1980 = vmatmul.msk.f32.gmra.mxu2 %vm272_vm3, %v2643_v38 }
 0x2bb   :  { %1981 = vmatmul.msk.f32.gmra.mxu2 %vm272_vm3, %v2674_v45 }
 0x2c3   :  { %1982 = vmatmul.msk.f32.gmra.mxu2 %vm272_vm3, %v2672_v44 }
 0x2cb   :  { %1983 = vmatmul.msk.f32.gmra.mxu2 %vm272_vm3, %v249_v42 }
 0x2d3   :  { %1984 = vmatmul.msk.f32.gmra.mxu2 %vm272_vm3, %v2659_v40 }
 0x2db   :  { %1985 = vmatmul.msk.f32.gmra.mxu2 %vm272_vm3, %v2667_v43 }
 0x2e3   :  { %1986 = vmatmul.msk.f32.gmra.mxu2 %vm272_vm3, %v2663_v41 }
 0x32e   :  { %v322_v54 = vpop.f32.mrf.mxu2 }
 0x32f   :  { %v346_v56 = vmul.f32 0.35355338, %v322_v54 }
 0x331   :  { %v354_v57 = vadd.f32 %v346_v56, %v230_v55 }
 0x333   :  { %v363_v58 = vsel %vm362_vm4, %v354_v57, -inf }
 0x334   :  { %364 = vmax.xlane.f32.xlu1 %v363_v58 }
 0x336   :  { %v325_v59 = vpop.f32.mrf.mxu2 }
 0x337   :  { %v347_v61 = vmul.f32 0.35355338, %v325_v59 }
 0x339   :  { %v355_v62 = vadd.f32 %v347_v61, %v231_v60 }
 0x33b   :  { %v366_v63 = vsel %vm362_vm4, %v355_v62, -inf }
 0x33c   :  { %367 = vmax.xlane.f32.xlu2 %v366_v63 }
 0x33e   :  { %v328_v0 = vpop.f32.mrf.mxu2 }
 0x33f   :  { %v348_v2 = vmul.f32 0.35355338, %v328_v0 }
 0x341   :  { %v2718_v3 = vadd.f32 %v348_v2, %v232_v1 }
 0x343   :  { %v369_v4 = vsel %vm362_vm4, %v2718_v3, -inf }
 0x344   :  { %370 = vmax.xlane.f32.xlu0 %v369_v4 }
 0x346   :  { %v331_v5 = vpop.f32.mrf.mxu2 }
 0x347   :  { %v349_v19 = vmul.f32 0.35355338, %v331_v5 }
 0x349   :  { %v357_v23 = vadd.f32 %v349_v19, %v233_v20 }
 0x34b   :  { %v372_v28 = vsel %vm362_vm4, %v357_v23, -inf }
 0x34e   :  { %v334_v6 = vpop.f32.mrf.mxu2 }
 0x34f   :  { %v350_v8 = vmul.f32 0.35355338, %v334_v6 }
 0x351   :  { %v2725_v9 = vadd.f32 %v350_v8, %v234_v7 }
 0x353   :  { %v375_v11 = vsel %vm362_vm4, %v2725_v9, -inf }
 0x354   :  { %2101 = vrot.lane.b32.xlu2 %v2100_v10, %s2416_s20  ;;  %376 = vmax.xlane.f32.xlu1 %v375_v11 }
 0x356   :  { %v337_v13 = vpop.f32.mrf.mxu2 }
 0x357   :  { %v351_v27 = vmul.f32 0.35355338, %v337_v13 }
 0x358   :  { %2096 = vrot.lane.b32.xlu0 %v2095_v12, %s2416_s20 }
 0x359   :  { %v2748_v32 = vadd.f32 %v351_v27, %v235_v31 }
 0x35b   :  { %v378_v36 = vsel %vm362_vm4, %v2748_v32, -inf }
 0x35e   :  { %v340_v14 = vpop.f32.mrf.mxu2 }
 0x35f   :  { %v352_v16 = vmul.f32 0.35355338, %v340_v14 }
 0x361   :  { %v360_v17 = vadd.f32 %v352_v16, %v236_v15 }
 0x363   :  { %v381_v18 = vsel %vm362_vm4, %v360_v17, -inf }
 0x364   :  { %382 = vmax.xlane.f32.xlu1 %v381_v18 }
 0x366   :  { %v343_v21 = vpop.f32.mrf.mxu2 }
 0x367   :  { %v353_v25 = vmul.f32 0.35355338, %v343_v21 }
 0x369   :  { %v361_v29 = vadd.f32 %v353_v25, %v237_v26 }
 0x36b   :  { %v384_v34 = vsel %vm362_vm4, %v361_v29, -inf }
 0x37d   :  { %373 = vmax.xlane.f32.xlu2 %v372_v28 }
 0x382   :  { %385 = vmax.xlane.f32.xlu0 %v384_v34 }
 0x385   :  { %379 = vmax.xlane.f32.xlu2 %v378_v36 }
 0x39d   :  { %2111 = vrot.lane.b32.xlu2 %v2110_v37, %s2416_s20 }
 0x3a7   :  { %v365_v40 = vpop.xlane.xlu1 %364 }
 0x3a8   :  { %v387_v41 = vsub.f32 %v354_v57, %v365_v40 }
 0x3aa   :  { %v395_v42 = vmul.f32 1.442695, %v387_v41 }
 0x3ac   :  { %2156 = vpow2.f32 %v395_v42 }
 0x3af   :  { %v368_v43 = vpop.xlane.xlu2 %367 }
 0x3b0   :  { %v388_v48 = vsub.f32 %v355_v62, %v368_v43 }
 0x3b2   :  { %v2756_v46 = vpop.eup %2156  ;;  %v397_v49 = vmul.f32 1.442695, %v388_v48 }
 0x3b3   :  { %v411_v47 = vsel %vm362_vm4, %v2756_v46, 0.0 }
 0x3b4   :  { %412 = vadd.xlane.f32.xlu1 %v411_v47  ;;  %2158 = vpow2.f32 %v397_v49 }
 0x3b7   :  { %v371_v51 = vpop.xlane.xlu0 %370  ;;  %v2102_v54 = vpop.permute.xlu2 %2101 }
 0x3b8   :  { %v2103_v57 = vunpack.i.l.bf16 %v2102_v54  ;;  %v2104_v58 = vunpack.i.h.bf16 %v2102_v54  ;;  %v389_v45 = vsub.f32 %v2718_v3, %v371_v51 }
 0x3ba   :  { %v2760_v50 = vpop.eup %2158  ;;  %v399_v63 = vmul.f32 1.442695, %v389_v45 }
 0x3bb   :  { %v414_v38 = vsel %vm362_vm4, %v2760_v50, 0.0 }
 0x3c6   :  { %415 = vadd.xlane.f32.xlu2 %v414_v38 }
 0x3c7   :  { %v377_v56 = vpop.xlane.xlu1 %376 }
 0x3c8   :  { %v391_v4 = vsub.f32 %v2725_v9, %v377_v56 }
 0x3ca   :  { %v2097_v39 = vpop.permute.xlu0 %2096  ;;  %v403_v10 = vmul.f32 1.442695, %v391_v4  ;;  %v238_v4 = vld [vmem:[%s3507_s10] sm:$0xff] }
 0x3cb   :  { %v2098_v53 = vunpack.i.l.bf16 %v2097_v39  ;;  %v2099_v55 = vunpack.i.h.bf16 %v2097_v39 }
 0x3cd   :  { %507 = vmatpush.msra.mxu3 %v2098_v53  ;;  %2106 = vrot.lane.b32.xlu1 %v2105_v52, %s2416_s20 }
 0x3cf   :  { %508 = vmatpush.msra.mxu3 %v2099_v55 }
 0x3d1   :  { %509 = vmatpush.msra.mxu3 %v2103_v57 }
 0x3d3   :  { %510 = vmatpush.msra.mxu3 %v2104_v58 }
 0x3d7   :  { %v383_v59 = vpop.xlane.xlu1 %382 }
 0x3d8   :  { %v393_v60 = vsub.f32 %v360_v17, %v383_v59 }
 0x3da   :  { %v407_v61 = vmul.f32 1.442695, %v393_v60 }
 0x3dc   :  { %2160 = vpow2.f32 %v407_v61 }
 0x3dd   :  { %2162 = vpow2.f32 %v399_v63 }
 0x3e2   :  { %v2767_v62 = vpop.eup %2160 }
 0x3e3   :  { %v429_v44 = vsel %vm362_vm4, %v2767_v62, 0.0  ;;  %v2163_v2 = vpop.eup %2162 }
 0x3e4   :  { %430 = vadd.xlane.f32.xlu2 %v429_v44  ;;  %v417_v8 = vsel %vm362_vm4, %v2163_v2, 0.0 }
 0x3f0   :  { %v374_v0 = vpop.xlane.xlu2 %373 }
 0x3f1   :  { %v390_v1 = vsub.f32 %v357_v23, %v374_v0  ;;  %v241_v0 = vld [vmem:[%s3507_s10 + $0x18] sm:$0xff] }
 0x3f2   :  { %591 = vmatpush.msrb.mxu1 %v241_v0  ;;  %v805_v0 = vld [vmem:[%s3539_s0 + $0x20] sm:$0xff] }
 0x3f3   :  { %v401_v5 = vmul.f32 1.442695, %v390_v1  ;;  %v240_v1 = vld [vmem:[%s3507_s10 + $0x10] sm:$0xff] }
 0x3f4   :  { %592 = vmatpush.msrb.mxu1 %v240_v1 }
 0x3f5   :  { %2164 = vpow2.f32 %v401_v5  ;;  %v386_v6 = vpop.xlane.xlu0 %385 }
 0x3f6   :  { %v394_v7 = vsub.f32 %v361_v29, %v386_v6 }
 0x3f7   :  { %418 = vadd.xlane.f32.xlu1 %v417_v8 }
 0x3f8   :  { %v409_v11 = vmul.f32 1.442695, %v394_v7  ;;  %v380_v12 = vpop.xlane.xlu2 %379 }
 0x3f9   :  { %v392_v3 = vsub.f32 %v2748_v32, %v380_v12 }
 0x3fa   :  { %2166 = vpow2.f32 %v409_v11 }
 0x3fb   :  { %v2165_v13 = vpop.eup %2164  ;;  %2168 = vpow2.f32 %v403_v10  ;;  %v405_v15 = vmul.f32 1.442695, %v392_v3 }
 0x3fc   :  { %v420_v14 = vsel %vm362_vm4, %v2165_v13, 0.0 }
 0x3fd   :  { %421 = vadd.xlane.f32.xlu0 %v420_v14  ;;  %2170 = vpow2.f32 %v405_v15 }
 0x400   :  { %v2167_v9 = vpop.eup %2166  ;;  %v2112_v23 = vpop.permute.xlu2 %2111 }
 0x401   :  { %v2169_v16 = vpop.eup %2168  ;;  %v432_v17 = vsel %vm362_vm4, %v2167_v9, 0.0  ;;  %v2113_v31 = vunpack.i.l.bf16 %v2112_v23  ;;  %v2114_v32 = vunpack.i.h.bf16 %v2112_v23 }
 0x402   :  { %433 = vadd.xlane.f32.xlu1 %v432_v17  ;;  %v423_v18 = vsel %vm362_vm4, %v2169_v16, 0.0 }
 0x403   :  { %v2171_v19 = vpop.eup %2170 }
 0x404   :  { %v426_v20 = vsel %vm362_vm4, %v2171_v19, 0.0 }
 0x405   :  { %424 = vadd.xlane.f32.xlu0 %v423_v18 }
 0x40d   :  { %427 = vadd.xlane.f32.xlu0 %v426_v20 }
 0x427   :  { %v413_v21 = vpop.xlane.xlu1 %412 }
 0x428   :  { %2172 = vrcp.f32 %v413_v21 }
 0x42e   :  { %v2173_v29 = vpop.eup %2172 }
 0x42f   :  { %v443_v34 = vmul.f32 %v2173_v29, %v2756_v46 }
 0x439   :  { %v416_v28 = vpop.xlane.xlu2 %415 }
 0x43a   :  { %2174 = vrcp.f32 %v416_v28 }
 0x43f   :  { %v2107_v25 = vpop.permute.xlu1 %2106 }
 0x440   :  { %v2108_v26 = vunpack.i.l.bf16 %v2107_v25  ;;  %v2109_v27 = vunpack.i.h.bf16 %v2107_v25  ;;  %v2175_v36 = vpop.eup %2174 }
 0x441   :  { %v444_v37 = vmul.f32 %v2175_v36, %v2760_v50 }
 0x442   :  { %511 = vmatpush.msra.mxu3 %v2108_v26 }
 0x444   :  { %512 = vmatpush.msra.mxu3 %v2109_v27  ;;  %v2419_v27 = vmov 32.0  }
 0x446   :  { %513 = vmatpush.msra.mxu3 %v2113_v31 }
 0x448   :  { %514 = vmatpush.msra.mxu3 %v2114_v32 }
 0x449   :  { %1987 = vmatmul.msk.f32.vlgmr.msra.gmra.mxu3 %vm362_vm4, %v443_v34 }
 0x451   :  { %1988 = vmatmul.msk.f32.gmra.mxu3 %vm362_vm4, %v444_v37 }
 0x457   :  { %v431_v38 = vpop.xlane.xlu2 %430 }
 0x46a   :  { %v419_v40 = vpop.xlane.xlu1 %418 }
 0x46b   :  { %2176 = vrcp.f32 %v419_v40 }
 0x470   :  { %v422_v41 = vpop.xlane.xlu0 %421 }
 0x471   :  { %v2177_v42 = vpop.eup %2176  ;;  %2178 = vrcp.f32 %v422_v41 }
 0x472   :  { %v445_v43 = vmul.f32 %v2177_v42, %v2163_v2  ;;  %v239_v2 = vld [vmem:[%s3507_s10 + $0x8] sm:$0xff] }
 0x473   :  { %593 = vmatpush.msrb.mxu1 %v239_v2  ;;  %v804_v2 = vld [vmem:[%s3539_s0 + $0x18] sm:$0xff] }
 0x474   :  { %1989 = vmatmul.msk.f32.gmra.mxu3 %vm362_vm4, %v445_v43 }
 0x475   :  { %v434_v53 = vpop.xlane.xlu1 %433  ;;  %594 = vmatpush.msrb.mxu1 %v238_v4  ;;  %v803_v4 = vld [vmem:[%s3539_s0 + $0x10] sm:$0xff] }
 0x477   :  { %v2179_v47 = vpop.eup %2178 }
 0x478   :  { %v425_v48 = vpop.xlane.xlu0 %424  ;;  %v446_v46 = vmul.f32 %v2179_v47, %v2165_v13 }
 0x479   :  { %2180 = vrcp.f32 %v425_v48 }
 0x47c   :  { %1990 = vmatmul.msk.f32.gmra.mxu3 %vm362_vm4, %v446_v46 }
 0x47f   :  { %v2181_v49 = vpop.eup %2180 }
 0x480   :  { %v428_v51 = vpop.xlane.xlu0 %427  ;;  %v447_v50 = vmul.f32 %v2181_v49, %v2169_v16  ;;  %v572_v16 = vperm.slane %v2640_v35, 1 }
 0x481   :  { %2182 = vrcp.f32 %v428_v51  ;;  %v788_v51 = vld [vmem:[%s3538_s27 + $0x8] sm:$0xff] }
 0x482   :  { %2184 = vrcp.f32 %v431_v38  ;;  %v663_v38 = vld [vmem:[%s3508_s11 + $0x10] sm:$0xff] }
 0x483   :  { %2186 = vrcp.f32 %v434_v53  ;;  %v816_v53 = vld [vmem:[%s3539_s0 + $0x78] sm:$0xff] }
 0x484   :  { %1991 = vmatmul.msk.f32.gmra.mxu3 %vm362_vm4, %v447_v50  ;;  %2188 = vrcp.f32 %v2419_v27  ;;  %v664_v50 = vld [vmem:[%s3508_s11 + $0x18] sm:$0xff] }
 0x485   :  { %684 = vmatpush.msra.mxu1 %v664_v50  ;;  %v665_v50 = vperm.slane %v2640_v35, 4 }
 0x487   :  { %v2183_v39 = vpop.eup %2182  ;;  %685 = vmatpush.msra.mxu1 %v663_v38 }
 0x488   :  { %v448_v52 = vmul.f32 %v2183_v39, %v2171_v19  ;;  %v2185_v54 = vpop.eup %2184  ;;  %v662_v39 = vld [vmem:[%s3508_s11 + $0x8] sm:$0xff] }
 0x489   :  { %v449_v55 = vmul.f32 %v2185_v54, %v2767_v62  ;;  %v2187_v56 = vpop.eup %2186  ;;  %686 = vmatpush.msra.mxu1 %v662_v39  ;;  %v815_v54 = vld [vmem:[%s3539_s0 + $0x70] sm:$0xff] }
 0x48a   :  { %v450_v57 = vmul.f32 %v2187_v56, %v2167_v9  ;;  %v2189_v28 = vpop.eup %2188  ;;  %v813_v56 = vld [vmem:[%s3539_s0 + $0x60] sm:$0xff] }
 0x48b   :  { %v611_v29 = vmul.f32 32.0, %v2189_v28  ;;  %vm615_vm7 = vweird.f32 %v2189_v28 }
 0x48c   :  { %1992 = vmatmul.msk.f32.gmra.mxu3 %vm362_vm4, %v448_v52  ;;  %v661_v52 = vld [vmem:[%s3508_s11] sm:$0xff] }
 0x48d   :  { %v612_v31 = vsub.f32 1.0, %v611_v29  ;;  %687 = vmatpush.msra.mxu1 %v661_v52  ;;  %v701_v29 = vld [vmem:[%s3509_s12 + $0x20] sm:$0xff] }
 0x48f   :  { %v613_v32 = vmul.f32 %v2189_v28, %v612_v31 }
 0x491   :  { %v614_v34 = vadd.f32 %v2189_v28, %v613_v32 }
 0x493   :  { %v2824_v36 = vsel %vm615_vm7, %v2189_v28, %v614_v34  ;;  %v700_v34 = vld [vmem:[%s3509_s12 + $0x18] sm:$0xff] }
 0x494   :  { %1993 = vmatmul.msk.f32.gmra.mxu3 %vm362_vm4, %v449_v55  ;;  %v814_v55 = vld [vmem:[%s3539_s0 + $0x68] sm:$0xff] }
 0x49c   :  { %1994 = vmatmul.msk.f32.gmra.mxu3 %vm362_vm4, %v450_v57  ;;  %v812_v57 = vld [vmem:[%s3539_s0 + $0x58] sm:$0xff] }
 0x4cc   :  { %v516_v58 = vpop.f32.mrf.mxu3 }
 0x4d4   :  { %v519_v59 = vpop.f32.mrf.mxu3 }
 0x4f7   :  { %v522_v60 = vpop.f32.mrf.mxu3 }
 0x4f8   :  { %542 = vrot.lane.b32.xlu0 %v522_v60, %s2406_s25  ;;  %v809_v60 = vld [vmem:[%s3539_s0 + $0x40] sm:$0xff] }
 0x4ff   :  { %v525_v61 = vpop.f32.mrf.mxu3 }
 0x500   :  { %544 = vrot.lane.b32.xlu0 %v525_v61, %s2406_s25  ;;  %v808_v61 = vld [vmem:[%s3539_s0 + $0x38] sm:$0xff] }
 0x507   :  { %v528_v44 = vpop.f32.mrf.mxu3 }
 0x508   :  { %550 = vrot.lane.b32.xlu2 %v528_v44, %s2417_s24  ;;  %v807_v44 = vld [vmem:[%s3539_s0 + $0x30] sm:$0xff] }
 0x50f   :  { %v531_v45 = vpop.f32.mrf.mxu3 }
 0x510   :  { %552 = vrot.lane.b32.xlu2 %v531_v45, %s2417_s24 }
 0x517   :  { %v534_v62 = vpop.f32.mrf.mxu3 }
 0x518   :  { %558 = vrot.lane.b32.xlu1 %v534_v62, %s2418_s30  ;;  %v806_v62 = vld [vmem:[%s3539_s0 + $0x28] sm:$0xff] }
 0x51f   :  { %v537_v63 = vpop.f32.mrf.mxu3 }
 0x520   :  { %560 = vrot.lane.b32.xlu0 %v537_v63, %s2418_s30 }
 0x562   :  { %v551_v6 = vpop.permute.xlu2 %550 }
 0x56a   :  { %v543_v5 = vpop.permute.xlu0 %542  ;;  %v553_v3 = vpop.permute.xlu2 %552 }
 0x56b   :  { %v564_v7 = vsel %vm272_vm3, %v516_v58, %v543_v5  ;;  %v811_v58 = vld [vmem:[%s3539_s0 + $0x50] sm:$0xff] }
 0x56c   :  { %v567_v11 = vsel %vm566_vm5, %v564_v7, %v551_v6  ;;  %v802_v6 = vld [vmem:[%s3539_s0 + $0x8] sm:$0xff] }
 0x572   :  { %v545_v8 = vpop.permute.xlu0 %544 }
 0x573   :  { %v565_v13 = vsel %vm272_vm3, %v519_v59, %v545_v8  ;;  %v810_v59 = vld [vmem:[%s3539_s0 + $0x48] sm:$0xff]  ;;  %v801_v8 = vld [vmem:[%s3539_s0] sm:$0xff]  ;;  %s1950_s0 = sshll.u32 %s3519_s22, 4  ;;  %s1951_s0 = int_to_ptr.hbm [resolvable:$true] %s1950_s0 }
 0x574   :  { %v568_v15 = vsel %vm566_vm5, %v565_v13, %v553_v3 }
 0x58a   :  { %v559_v10 = vpop.permute.xlu1 %558 }
 0x58b   :  { %v570_v12 = vsel %vm569_vm6, %v567_v11, %v559_v10 }
 0x58c   :  { %1995 = vmatmul.msk.f32.vlgmr.msrb.gmra.mxu1 %vm200_vm2, %v570_v12 }
 0x58d   :  { %819 = vmatpush.msrb.mxu1 %v816_v53 }
 0x58f   :  { %820 = vmatpush.msrb.mxu1 %v815_v54 }
 0x591   :  { %821 = vmatpush.msrb.mxu1 %v814_v55 }
 0x592   :  { %v561_v14 = vpop.permute.xlu0 %560 }
 0x593   :  { %v571_v9 = vsel %vm569_vm6, %v568_v15, %v561_v14  ;;  %822 = vmatpush.msrb.mxu1 %v813_v56  ;;  %v817_v56 = vld [vmem:[#allocation5] sm:$0xff] }
 0x594   :  { %1996 = vmatmul.msk.f32.gmra.mxu1 %vm200_vm2, %v571_v9 }
 0x595   :  { %823 = vmatpush.msrb.mxu1 %v812_v57 }
 0x597   :  { %824 = vmatpush.msrb.mxu1 %v811_v58 }
 0x599   :  { %825 = vmatpush.msrb.mxu1 %v810_v59  ;;  %v818_v59 = vld [vmem:[#allocation5 + $0x8] sm:$0xff] }
 0x59b   :  { %826 = vmatpush.msrb.mxu1 %v809_v60 }
 0x59d   :  { %827 = vmatpush.msrb.mxu1 %v808_v61 }
 0x59f   :  { %828 = vmatpush.msrb.mxu1 %v807_v44 }
 0x5a1   :  { %829 = vmatpush.msrb.mxu1 %v806_v62 }
 0x5a3   :  { %830 = vmatpush.msrb.mxu1 %v805_v0 }
 0x5a5   :  { %831 = vmatpush.msrb.mxu1 %v804_v2 }
 0x5a7   :  { %832 = vmatpush.msrb.mxu1 %v803_v4 }
 0x5a9   :  { %833 = vmatpush.msrb.mxu1 %v802_v6 }
 0x5ab   :  { %834 = vmatpush.msrb.mxu1 %v801_v8 }
 0x609   :  { %v596_v17 = vpop.f32.mrf.mxu1 }
 0x60a   :  { %v597_v18 = vadd.f32 %v596_v17, %v572_v16  ;;  %v655_v17 = vperm.slane %v2640_v35, 2 }
 0x60c   :  { %v602_v19 = vadd.f32 %v597_v18, %v2632_v30  ;;  %v787_v30 = vld [vmem:[%s3538_s27] sm:$0xff]  ;;  %v704_v18 = vld [vmem:[%s3509_s12 + $0x38] sm:$0xff] }
 0x60d   :  { %720 = vmatpush.msrb.mxu0 %v704_v18  ;;  %v876_v18 = vld [vmem:[%s3504_s7] sm:$0xff] }
 0x60e   :  { %v604_v20 = vsel %vm200_vm2, %v602_v19, 0.0 }
 0x60f   :  { %605 = vadd.xlane.f32.xlu1 %v604_v20 }
 0x611   :  { %v599_v21 = vpop.f32.mrf.mxu1 }
 0x612   :  { %v600_v23 = vadd.f32 %v599_v21, %v572_v16 }
 0x614   :  { %v603_v25 = vadd.f32 %v600_v23, %v2636_v33 }
 0x616   :  { %v607_v26 = vsel %vm200_vm2, %v603_v25, 0.0 }
 0x617   :  { %608 = vadd.xlane.f32.xlu2 %v607_v26  ;;  %v702_v26 = vld [vmem:[%s3509_s12 + $0x28] sm:$0xff] }
 0x62f   :  { %790 = vperm.xlu2 %2115, %v787_v30  }
 0x682   :  { %v606_v37 = vpop.xlane.xlu1 %605 }
 0x683   :  { %v617_v33 = vmul.f32 %v2824_v36, %v606_v37 }
 0x685   :  { %v2827_v40 = vsub.f32 %v602_v19, %v617_v33  ;;  %v703_v19 = vld [vmem:[%s3509_s12 + $0x30] sm:$0xff] }
 0x686   :  { %721 = vmatpush.msrb.mxu0 %v703_v19 }
 0x687   :  { %v621_v41 = vmul.f32 %v2827_v40, %v2827_v40 }
 0x688   :  { %722 = vmatpush.msrb.mxu0 %v702_v26 }
 0x689   :  { %v623_v42 = vsel %vm200_vm2, %v621_v41, 0.0 }
 0x68a   :  { %624 = vadd.xlane.f32.xlu0 %v623_v42  ;;  %v609_v43 = vpop.xlane.xlu2 %608  ;;  %723 = vmatpush.msrb.mxu0 %v701_v29 }
 0x68b   :  { %v618_v47 = vmul.f32 %v2824_v36, %v609_v43 }
 0x68c   :  { %724 = vmatpush.msrb.mxu0 %v700_v34 }
 0x68d   :  { %v2833_v48 = vsub.f32 %v603_v25, %v618_v47  ;;  %v658_v25 = vperm.slane %v2640_v35, 3  ;;  %v699_v47 = vld [vmem:[%s3509_s12 + $0x10] sm:$0xff] }
 0x68e   :  { %725 = vmatpush.msrb.mxu0 %v699_v47 }
 0x68f   :  { %v622_v46 = vmul.f32 %v2833_v48, %v2833_v48 }
 0x691   :  { %v626_v49 = vsel %vm200_vm2, %v622_v46, 0.0  ;;  %v697_v46 = vld [vmem:[%s3509_s12] sm:$0xff] }
 0x692   :  { %627 = vadd.xlane.f32.xlu1 %v626_v49  ;;  %v791_v42 = vpop.permute.xlu2 %790  ;;  %v843_v49 = vld [vmem:[%s3510_s13 + $0x8] sm:$0xff] }
 0x693   :  { %vm795_vm14 = vcmp.eq.s32.totalorder %v2620_v22, %v791_v42 }
 0x69e   :  { %793 = vperm.xlu0 %2094, %v788_v51   ;;  %v842_v51 = vld [vmem:[%s3510_s13] sm:$0xff] }
 0x6fd   :  { %v625_v45 = vpop.xlane.xlu0 %624 }
 0x6fe   :  { %v629_v63 = vmul.f32 %v625_v45, %v2824_v36  ;;  %v2970_v45 = vld [vmem:[#allocation8 + $0x8] sm:$0xff] }
 0x6ff   :  { %v846_v62 = vperm.slane %v2970_v45, 0 }
 0x700   :  { %v631_v1 = vadd.f32 1e-05, %v629_v63 }
 0x702   :  { %2190 = vrsqrt.f32 %v631_v1  ;;  %vm639_vm9 = vweird.f32 %v631_v1 }
 0x705   :  { %v628_v5 = vpop.xlane.xlu1 %627 }
 0x706   :  { %v630_v7 = vmul.f32 %v628_v5, %v2824_v36 }
 0x708   :  { %v2191_v10 = vpop.eup %2190  ;;  %v632_v11 = vadd.f32 1e-05, %v630_v7 }
 0x709   :  { %v634_v12 = vmul.f32 %v2191_v10, %v631_v1  ;;  %vm640_vm8 = vweird.f32 %v2191_v10 }
 0x70a   :  { %2192 = vrsqrt.f32 %v632_v11  ;;  %vm641_vm10 = vmor %vm639_vm9, %vm640_vm8  ;;  %vm649_vm12 = vweird.f32 %v632_v11 }
 0x70b   :  { %v635_v13 = vmul.f32 %v2191_v10, %v634_v12 }
 0x70d   :  { %v636_v3 = vmul.f32 0.5, %v635_v13 }
 0x70f   :  { %v637_v14 = vsub.f32 1.5, %v636_v3 }
 0x710   :  { %v2193_v15 = vpop.eup %2192  ;;  %v794_v43 = vpop.permute.xlu0 %793 }
 0x711   :  { %v638_v9 = vmul.f32 %v2191_v10, %v637_v14  ;;  %v644_v16 = vmul.f32 %v2193_v15, %v632_v11  ;;  %vm650_vm11 = vweird.f32 %v2193_v15  ;;  %vm796_vm15 = vcmp.eq.s32.totalorder %v2620_v22, %v794_v43  ;;  %v845_v22 = vld [vmem:[%s3510_s13 + $0x18] sm:$0xff] }
 0x712   :  { %vm651_vm13 = vmor %vm649_vm12, %vm650_vm11 }
 0x713   :  { %v642_v20 = vsel %vm641_vm10, %v2191_v10, %v638_v9  ;;  %v645_v21 = vmul.f32 %v2193_v15, %v644_v16 }
 0x714   :  { %v653_v23 = vmul.f32 %v642_v20, %v2827_v40 }
 0x715   :  { %v646_v27 = vmul.f32 0.5, %v645_v21 }
 0x716   :  { %v656_v28 = vmul.f32 %v655_v17, %v653_v23 }
 0x717   :  { %v647_v31 = vsub.f32 1.5, %v646_v27 }
 0x718   :  { %v2918_v32 = vadd.f32 %v658_v25, %v656_v28 }
 0x719   :  { %v648_v30 = vmul.f32 %v2193_v15, %v647_v31  ;;  %v878_v31 = vld [vmem:[%s3504_s7 + $0x10] sm:$0xff] }
 0x71a   :  { %1997 = vmatmul.msk.f32.vlgmr.msra.gmra.mxu1 %vm200_vm2, %v2918_v32 }
 0x71b   :  { %v652_v37 = vsel %vm651_vm13, %v2193_v15, %v648_v30 }
 0x71c   :  { %v654_v33 = vmul.f32 %v652_v37, %v2833_v48  ;;  %v698_v48 = vld [vmem:[%s3509_s12 + $0x8] sm:$0xff] }
 0x71d   :  { %726 = vmatpush.msrb.mxu0 %v698_v48 }
 0x71e   :  { %v657_v40 = vmul.f32 %v655_v17, %v654_v33 }
 0x71f   :  { %727 = vmatpush.msrb.mxu0 %v697_v46  ;;  %v880_v46 = vld [vmem:[%s3504_s7 + $0x20] sm:$0xff] }
 0x720   :  { %v2926_v41 = vadd.f32 %v658_v25, %v657_v40  ;;  %v877_v25 = vld [vmem:[%s3504_s7 + $0x8] sm:$0xff]  ;;  %v879_v40 = vld [vmem:[%s3504_s7 + $0x18] sm:$0xff] }
 0x721   :  { %865 = vmatpush.msra.mxu0 %v845_v22 }
 0x722   :  { %1998 = vmatmul.msk.f32.gmra.mxu1 %vm200_vm2, %v2926_v41 }
 0x72a   :  { %2003 = vmatmul.msk.f32.vlgmr.msrb.gmra.mxu1 %vm795_vm14, %v2411_v24 }
 0x732   :  { %2004 = vmatmul.msk.f32.gmra.mxu1 %vm796_vm15, %v2411_v24  ;;  %v844_v24 = vld [vmem:[%s3510_s13 + $0x10] sm:$0xff] }
 0x733   :  { %866 = vmatpush.msra.mxu0 %v844_v24 }
 0x735   :  { %867 = vmatpush.msra.mxu0 %v843_v49 }
 0x737   :  { %868 = vmatpush.msra.mxu0 %v842_v51 }
 0x797   :  { %v689_v38 = vpop.f32.mrf.mxu1 }
 0x798   :  { %v690_v39 = vadd.f32 %v689_v38, %v665_v50 }
 0x79a   :  { %v695_v52 = vmax.f32 %v690_v39, 0.0  ;;  %v882_v39 = vld [vmem:[%s3504_s7 + $0x30] sm:$0xff] }
 0x79c   :  { %1999 = vmatmul.msk.f32.vlgmr.msrb.gmra.mxu0 %vm362_vm4, %v695_v52 }
 0x79f   :  { %v692_v53 = vpop.f32.mrf.mxu1 }
 0x7a0   :  { %v693_v54 = vadd.f32 %v692_v53, %v665_v50 }
 0x7a2   :  { %v696_v55 = vmax.f32 %v693_v54, 0.0 }
 0x7a4   :  { %2000 = vmatmul.msk.f32.gmra.mxu0 %vm362_vm4, %v696_v55 }
 0x7a7   :  { %v836_v57 = vpop.f32.mrf.mxu1 }
 0x7a8   :  { %v2958_v58 = vadd.f32 %v836_v57, %v817_v56  ;;  %v881_v57 = vld [vmem:[%s3504_s7 + $0x28] sm:$0xff] }
 0x7ac   :  { %2005 = vmatmul.msk.f32.vlgmr.msra.gmra.mxu0 %vm200_vm2, %v2958_v58 }
 0x7af   :  { %v839_v60 = vpop.f32.mrf.mxu1 }
 0x7b0   :  { %v2962_v35 = vadd.f32 %v839_v60, %v818_v59 }
 0x7b4   :  { %2006 = vmatmul.msk.f32.gmra.mxu0 %vm200_vm2, %v2962_v35 }
 0x819   :  { %v2966_v61 = vpop.f32.mrf.mxu0 }
 0x821   :  { %v2968_v44 = vpop.f32.mrf.mxu0 }
 0x829   :  { %v870_v63 = vpop.f32.mrf.mxu0 }
 0x82a   :  { %v2973_v0 = vadd.f32 %v870_v63, %v846_v62 }
 0x82c   :  { %898 = vrot.lane.b32.xlu0 %v2973_v0, %s2414_s2 }
 0x831   :  { %v873_v1 = vpop.f32.mrf.mxu0 }
 0x832   :  { %v2977_v2 = vadd.f32 %v873_v1, %v846_v62  ;;  %v883_v1 = vld [vmem:[%s3504_s7 + $0x38] sm:$0xff] }
 0x834   :  { %892 = vrot.lane.b32.xlu0 %v2977_v2, %s2412_s9  ;;  %896 = vrot.lane.b32.xlu2 %v2977_v2, %s2413_s26 }
 0x835   :  { %900 = vrot.lane.b32.xlu1 %v2977_v2, %s2414_s2 }
 0x83c   :  { %890 = vrot.lane.b32.xlu2 %v2973_v0, %s2412_s9 }
 0x83d   :  { %894 = vrot.lane.b32.xlu1 %v2973_v0, %s2413_s26 }
 0x88e   :  { %v2989_v4 = vpop.permute.xlu2 %896 }
 0x88f   :  { %912 = vrot.lane.b32.xlu2 %v2989_v4, %s2415_s3 }
 0x896   :  { %v2993_v5 = vpop.permute.xlu2 %890 }
 0x897   :  { %906 = vrot.lane.b32.xlu2 %v2993_v5, %s2415_s3 }
 0x89e   :  { %v2997_v6 = vpop.permute.xlu0 %898 }
 0x89f   :  { %914 = vrot.lane.b32.xlu0 %v2997_v6, %s2415_s3 }
 0x8a6   :  { %v3001_v7 = vpop.permute.xlu0 %892 }
 0x8a7   :  { %v3003_v8 = vpop.permute.xlu1 %900  ;;  %908 = vrot.lane.b32.xlu0 %v3001_v7, %s2415_s3 }
 0x8a8   :  { %916 = vrot.lane.b32.xlu1 %v3003_v8, %s2415_s3  ;;  %v2116_v54 = vpack.i.bf16 %v2997_v6, %v3003_v8 }
 0x8af   :  { %v895_v10 = vpop.permute.xlu1 %894  ;;  %902 = vrot.lane.b32.xlu0 %v2973_v0, %s2415_s3 }
 0x8b0   :  { %910 = vrot.lane.b32.xlu1 %v895_v10, %s2415_s3  ;;  %v2121_v51 = vpack.i.bf16 %v895_v10, %v2989_v4 }
 0x8b8   :  { %904 = vrot.lane.b32.xlu1 %v2977_v2, %s2415_s3 }
 0x8e9   :  { %v913_v13 = vpop.permute.xlu2 %912 }
 0x8f1   :  { %v907_v15 = vpop.permute.xlu2 %906 }
 0x911   :  { %v915_v12 = vpop.permute.xlu0 %914 }
 0x919   :  { %v909_v14 = vpop.permute.xlu0 %908 }
 0x91a   :  { %v917_v11 = vpop.permute.xlu1 %916 }
 0x91b   :  { %2007 = vmatpush.xpose.msk.msrb.mxu3 %vm272_vm3, %v917_v11 }
 0x91f   :  { %2008 = vmatpush.xpose.msk.msrb.mxu3 %vm272_vm3, %v915_v12 }
 0x921   :  { %v903_v16 = vpop.permute.xlu0 %902 }
 0x922   :  { %v911_v3 = vpop.permute.xlu1 %910 }
 0x923   :  { %2009 = vmatpush.xpose.msk.msrb.mxu3 %vm272_vm3, %v913_v13 }
 0x927   :  { %2010 = vmatpush.xpose.msk.msrb.mxu3 %vm272_vm3, %v911_v3 }
 0x92a   :  { %v905_v9 = vpop.permute.xlu1 %904 }
 0x92b   :  { %2011 = vmatpush.xpose.msk.msrb.mxu3 %vm272_vm3, %v909_v14 }
 0x92f   :  { %2012 = vmatpush.xpose.msk.msrb.mxu3 %vm272_vm3, %v907_v15 }
 0x933   :  { %2013 = vmatpush.xpose.msk.msrb.mxu3 %vm272_vm3, %v905_v9 }
 0x937   :  { %2014 = vmatpush.xpose.msk.msrb.mxu3 %vm272_vm3, %v903_v16 }
 0x93a   :  { %2015 = vmatmul.msk.f32.vlgmr.msrb.gmra.mxu3 %vm272_vm3, %v2973_v0 }
 0x942   :  { %2016 = vmatmul.msk.f32.gmra.mxu3 %vm272_vm3, %v2977_v2 }
 0x94a   :  { %2017 = vmatmul.msk.f32.gmra.mxu3 %vm272_vm3, %v2993_v5 }
 0x952   :  { %2018 = vmatmul.msk.f32.gmra.mxu3 %vm272_vm3, %v3001_v7 }
 0x95a   :  { %2019 = vmatmul.msk.f32.gmra.mxu3 %vm272_vm3, %v895_v10 }
 0x962   :  { %2020 = vmatmul.msk.f32.gmra.mxu3 %vm272_vm3, %v2989_v4 }
 0x96a   :  { %2021 = vmatmul.msk.f32.gmra.mxu3 %vm272_vm3, %v2997_v6 }
 0x972   :  { %2022 = vmatmul.msk.f32.gmra.mxu3 %vm272_vm3, %v3003_v8  ;;  %v2131_v8 = vpack.i.bf16 %v2973_v0, %v2977_v2 }
 0x9bd   :  { %v967_v17 = vpop.f32.mrf.mxu3 }
 0x9be   :  { %v991_v19 = vmul.f32 0.35355338, %v967_v17 }
 0x9c0   :  { %v999_v20 = vadd.f32 %v991_v19, %v876_v18 }
 0x9c2   :  { %v1007_v21 = vsel %vm362_vm4, %v999_v20, -inf }
 0x9c3   :  { %1008 = vmax.xlane.f32.xlu2 %v1007_v21 }
 0x9c5   :  { %v970_v23 = vpop.f32.mrf.mxu3 }
 0x9c6   :  { %v992_v26 = vmul.f32 0.35355338, %v970_v23 }
 0x9c8   :  { %v1000_v27 = vadd.f32 %v992_v26, %v877_v25 }
 0x9ca   :  { %v1010_v28 = vsel %vm362_vm4, %v1000_v27, -inf }
 0x9cb   :  { %1011 = vmax.xlane.f32.xlu1 %v1010_v28 }
 0x9cd   :  { %v973_v29 = vpop.f32.mrf.mxu3 }
 0x9ce   :  { %v993_v34 = vmul.f32 0.35355338, %v973_v29 }
 0x9d0   :  { %v3048_v30 = vadd.f32 %v993_v34, %v878_v31  ;;  %v2126_v31 = vpack.i.bf16 %v2993_v5, %v3001_v7 }
 0x9d2   :  { %v1013_v37 = vsel %vm362_vm4, %v3048_v30, -inf }
 0x9d3   :  { %1014 = vmax.xlane.f32.xlu0 %v1013_v37 }
 0x9d5   :  { %v976_v33 = vpop.f32.mrf.mxu3 }
 0x9d6   :  { %v994_v42 = vmul.f32 0.35355338, %v976_v33 }
 0x9d8   :  { %v1002_v43 = vadd.f32 %v994_v42, %v879_v40 }
 0x9da   :  { %v1016_v47 = vsel %vm362_vm4, %v1002_v43, -inf }
 0x9db   :  { %1017 = vmax.xlane.f32.xlu2 %v1016_v47 }
 0x9dd   :  { %v979_v48 = vpop.f32.mrf.mxu3 }
 0x9de   :  { %v995_v22 = vmul.f32 0.35355338, %v979_v48 }
 0x9e0   :  { %v1003_v24 = vadd.f32 %v995_v22, %v880_v46 }
 0x9e2   :  { %v1019_v49 = vsel %vm362_vm4, %v1003_v24, -inf }
 0x9e3   :  { %1020 = vmax.xlane.f32.xlu1 %v1019_v49 }
 0x9e5   :  { %v982_v50 = vpop.f32.mrf.mxu3 }
 0x9e6   :  { %v996_v56 = vmul.f32 0.35355338, %v982_v50 }
 0x9e7   :  { %2122 = vrot.lane.b32.xlu0 %v2121_v51, %s2416_s20 }
 0x9e8   :  { %v3072_v59 = vadd.f32 %v996_v56, %v881_v57 }
 0x9ea   :  { %v1022_v62 = vsel %vm362_vm4, %v3072_v59, -inf }
 0x9ed   :  { %v985_v38 = vpop.f32.mrf.mxu3 }
 0x9ee   :  { %v997_v52 = vmul.f32 0.35355338, %v985_v38 }
 0x9f0   :  { %v1005_v53 = vadd.f32 %v997_v52, %v882_v39 }
 0x9f2   :  { %v1025_v55 = vsel %vm362_vm4, %v1005_v53, -inf }
 0x9f3   :  { %2117 = vrot.lane.b32.xlu2 %v2116_v54, %s2416_s20  ;;  %1026 = vmax.xlane.f32.xlu1 %v1025_v55 }
 0x9f5   :  { %v988_v60 = vpop.f32.mrf.mxu3 }
 0x9f6   :  { %v998_v63 = vmul.f32 0.35355338, %v988_v60 }
 0x9f8   :  { %v3079_v4 = vadd.f32 %v998_v63, %v883_v1 }
 0x9fa   :  { %v1028_v6 = vsel %vm362_vm4, %v3079_v4, -inf }
 0xa11   :  { %1023 = vmax.xlane.f32.xlu0 %v1022_v62 }
 0xa1c   :  { %1029 = vmax.xlane.f32.xlu2 %v1028_v6 }
 0xa25   :  { %2132 = vrot.lane.b32.xlu0 %v2131_v8, %s2416_s20 }
 0xa36   :  { %v1009_v10 = vpop.xlane.xlu2 %1008 }
 0xa37   :  { %v1031_v11 = vsub.f32 %v999_v20, %v1009_v10 }
 0xa39   :  { %v1039_v12 = vmul.f32 1.442695, %v1031_v11 }
 0xa3b   :  { %2194 = vpow2.f32 %v1039_v12 }
 0xa3e   :  { %v1012_v13 = vpop.xlane.xlu1 %1011 }
 0xa3f   :  { %v1032_v3 = vsub.f32 %v1000_v27, %v1012_v13 }
 0xa41   :  { %v3086_v14 = vpop.eup %2194  ;;  %v1041_v15 = vmul.f32 1.442695, %v1032_v3 }
 0xa42   :  { %v1055_v9 = vsel %vm362_vm4, %v3086_v14, 0.0 }
 0xa43   :  { %1056 = vadd.xlane.f32.xlu1 %v1055_v9  ;;  %2196 = vpow2.f32 %v1041_v15 }
 0xa46   :  { %v1015_v18 = vpop.xlane.xlu0 %1014 }
 0xa47   :  { %v1033_v46 = vsub.f32 %v3048_v30, %v1015_v18 }
 0xa49   :  { %v3090_v16 = vpop.eup %2196  ;;  %v1043_v22 = vmul.f32 1.442695, %v1033_v46 }
 0xa4a   :  { %v1058_v0 = vsel %vm362_vm4, %v3090_v16, 0.0 }
 0xa4e   :  { %v1018_v17 = vpop.xlane.xlu2 %1017 }
 0xa4f   :  { %v1034_v2 = vsub.f32 %v1002_v43, %v1018_v17  ;;  %1059 = vadd.xlane.f32.xlu0 %v1058_v0 }
 0xa51   :  { %v1045_v19 = vmul.f32 1.442695, %v1034_v2 }
 0xa53   :  { %2198 = vpow2.f32 %v1045_v19 }
 0xa56   :  { %v2118_v20 = vpop.permute.xlu2 %2117  ;;  %v1021_v21 = vpop.xlane.xlu1 %1020 }
 0xa57   :  { %v2119_v23 = vunpack.i.l.bf16 %v2118_v20  ;;  %v1035_v25 = vsub.f32 %v1003_v24, %v1021_v21  ;;  %v2120_v27 = vunpack.i.h.bf16 %v2118_v20 }
 0xa59   :  { %v3094_v26 = vpop.eup %2198  ;;  %v1047_v28 = vmul.f32 1.442695, %v1035_v25  ;;  %v2123_v29 = vpop.permute.xlu0 %2122  ;;  %1151 = vmatpush.msrb.mxu0 %v2119_v23 }
 0xa5a   :  { %v2124_v34 = vunpack.i.l.bf16 %v2123_v29  ;;  %v1064_v37 = vsel %vm362_vm4, %v3094_v26, 0.0  ;;  %v2125_v33 = vunpack.i.h.bf16 %v2123_v29 }
 0xa5b   :  { %2200 = vpow2.f32 %v1047_v28  ;;  %1152 = vmatpush.msrb.mxu0 %v2120_v27  ;;  %1065 = vadd.xlane.f32.xlu2 %v1064_v37 }
 0xa5c   :  { %2127 = vrot.lane.b32.xlu1 %v2126_v31, %s2416_s20 }
 0xa5d   :  { %1153 = vmatpush.msrb.mxu0 %v2124_v34 }
 0xa5f   :  { %1154 = vmatpush.msrb.mxu0 %v2125_v33 }
 0xa61   :  { %v3101_v40 = vpop.eup %2200 }
 0xa62   :  { %v1067_v42 = vsel %vm362_vm4, %v3101_v40, 0.0 }
 0xa63   :  { %1068 = vadd.xlane.f32.xlu2 %v1067_v42 }
 0xa66   :  { %v1027_v43 = vpop.xlane.xlu1 %1026 }
 0xa67   :  { %v1037_v5 = vsub.f32 %v1005_v53, %v1027_v43  ;;  %v3132_v43 = vld [vmem:[#allocation8] sm:$0xff] }
 0xa69   :  { %v1051_v7 = vmul.f32 1.442695, %v1037_v5  ;;  %v705_v5 = vperm.slane %v3132_v43, 5 }
 0xa6b   :  { %2202 = vpow2.f32 %v1051_v7 }
 0xa6c   :  { %2204 = vpow2.f32 %v1043_v22  ;;  %v733_v22 = vadd.f32 %v2968_v44, %v705_v5 }
 0xa71   :  { %v3105_v47 = vpop.eup %2202 }
 0xa72   :  { %v1073_v48 = vsel %vm362_vm4, %v3105_v47, 0.0  ;;  %v2205_v24 = vpop.eup %2204 }
 0xa73   :  { %1074 = vadd.xlane.f32.xlu2 %v1073_v48  ;;  %v1061_v50 = vsel %vm362_vm4, %v2205_v24, 0.0 }
 0xa84   :  { %v1024_v49 = vpop.xlane.xlu0 %1023 }
 0xa85   :  { %v1036_v51 = vsub.f32 %v3072_v59, %v1024_v49 }
 0xa86   :  { %1062 = vadd.xlane.f32.xlu1 %v1061_v50 }
 0xa87   :  { %v1049_v38 = vmul.f32 1.442695, %v1036_v51  ;;  %v886_v51 = vld [vmem:[%s3511_s14 + $0x10] sm:$0xff] }
 0xa89   :  { %2206 = vpow2.f32 %v1049_v38 }
 0xa8f   :  { %v2207_v39 = vpop.eup %2206  ;;  %v1030_v52 = vpop.xlane.xlu2 %1029 }
 0xa90   :  { %v1038_v53 = vsub.f32 %v3079_v4, %v1030_v52  ;;  %v1070_v54 = vsel %vm362_vm4, %v2207_v39, 0.0 }
 0xa91   :  { %1071 = vadd.xlane.f32.xlu0 %v1070_v54 }
 0xa92   :  { %v1053_v55 = vmul.f32 1.442695, %v1038_v53 }
 0xa94   :  { %2208 = vpow2.f32 %v1053_v55 }
 0xa97   :  { %v2133_v59 = vpop.permute.xlu0 %2132 }
 0xa98   :  { %v2134_v8 = vunpack.i.l.bf16 %v2133_v59  ;;  %v2135_v4 = vunpack.i.h.bf16 %v2133_v59 }
 0xa9a   :  { %v2209_v30 = vpop.eup %2208 }
 0xa9b   :  { %v1076_v56 = vsel %vm362_vm4, %v2209_v30, 0.0 }
 0xa9c   :  { %1077 = vadd.xlane.f32.xlu0 %v1076_v56 }
 0xab6   :  { %v1057_v57 = vpop.xlane.xlu1 %1056 }
 0xab7   :  { %2210 = vrcp.f32 %v1057_v57 }
 0xabd   :  { %v2211_v6 = vpop.eup %2210 }
 0xabe   :  { %v1087_v10 = vmul.f32 %v2211_v6, %v3086_v14 }
 0xac2   :  { %v1060_v1 = vpop.xlane.xlu0 %1059 }
 0xac3   :  { %2212 = vrcp.f32 %v1060_v1 }
 0xac9   :  { %v2213_v11 = vpop.eup %2212 }
 0xaca   :  { %v1088_v12 = vmul.f32 %v2213_v11, %v3090_v16 }
 0xace   :  { %v2128_v60 = vpop.permute.xlu1 %2127  ;;  %v1066_v3 = vpop.xlane.xlu2 %1065 }
 0xacf   :  { %v2129_v62 = vunpack.i.l.bf16 %v2128_v60  ;;  %v2130_v63 = vunpack.i.h.bf16 %v2128_v60 }
 0xad1   :  { %1155 = vmatpush.msrb.mxu0 %v2129_v62 }
 0xad3   :  { %1156 = vmatpush.msrb.mxu0 %v2130_v63 }
 0xad5   :  { %1157 = vmatpush.msrb.mxu0 %v2134_v8  ;;  %v1214_v8 = vperm.slane %v2970_v45, 1 }
 0xad6   :  { %v1069_v17 = vpop.xlane.xlu2 %1068 }
 0xad7   :  { %1158 = vmatpush.msrb.mxu0 %v2135_v4 }
 0xad8   :  { %2023 = vmatmul.msk.f32.vlgmr.msrb.gmra.mxu0 %vm362_vm4, %v1087_v10 }
 0xae0   :  { %2024 = vmatmul.msk.f32.gmra.mxu0 %vm362_vm4, %v1088_v12 }
 0xae6   :  { %v1075_v19 = vpop.xlane.xlu2 %1074 }
 0xaf9   :  { %v1063_v13 = vpop.xlane.xlu1 %1062 }
 0xafa   :  { %2214 = vrcp.f32 %v1063_v13 }
 0xafb   :  { %2216 = vrcp.f32 %v1066_v3  ;;  %v1333_v3 = vld [vmem:[%s3513_s16 + $0x18] sm:$0xff] }
 0xafc   :  { %2218 = vrcp.f32 %v1069_v17  ;;  %v1332_v17 = vld [vmem:[%s3513_s16 + $0x10] sm:$0xff] }
 0xb00   :  { %v2215_v15 = vpop.eup %2214 }
 0xb01   :  { %v1089_v9 = vmul.f32 %v2215_v15, %v2205_v24  ;;  %v2217_v0 = vpop.eup %2216  ;;  %v736_v24 = vadd.f32 %v733_v22, %v2926_v41  ;;  %v884_v41 = vld [vmem:[%s3511_s14] sm:$0xff] }
 0xb02   :  { %v1090_v14 = vmul.f32 %v2217_v0, %v3094_v26  ;;  %v2219_v18 = vpop.eup %2218  ;;  %v1331_v0 = vld [vmem:[%s3513_s16 + $0x8] sm:$0xff] }
 0xb03   :  { %2025 = vmatmul.msk.f32.gmra.mxu0 %vm362_vm4, %v1089_v9  ;;  %v1091_v16 = vmul.f32 %v2219_v18, %v3101_v40  ;;  %v740_v49 = vsel %vm200_vm2, %v736_v24, 0.0 }
 0xb04   :  { %v1072_v2 = vpop.xlane.xlu0 %1071 }
 0xb05   :  { %2220 = vrcp.f32 %v1072_v2 }
 0xb06   :  { %2222 = vrcp.f32 %v1075_v19 }
 0xb0b   :  { %2026 = vmatmul.msk.f32.gmra.mxu0 %vm362_vm4, %v1090_v14  ;;  %v2221_v20 = vpop.eup %2220 }
 0xb0c   :  { %v1092_v21 = vmul.f32 %v2221_v20, %v2207_v39  ;;  %v2223_v25 = vpop.eup %2222 }
 0xb0d   :  { %v1093_v26 = vmul.f32 %v2223_v25, %v3105_v47  ;;  %v730_v47 = vadd.f32 %v2966_v61, %v705_v5  ;;  %v887_v61 = vld [vmem:[%s3511_s14 + $0x18] sm:$0xff] }
 0xb0e   :  { %1233 = vmatpush.msra.mxu1 %v887_v61 }
 0xb0f   :  { %v1078_v23 = vpop.xlane.xlu0 %1077  ;;  %v735_v48 = vadd.f32 %v730_v47, %v2918_v32  ;;  %v885_v32 = vld [vmem:[%s3511_s14 + $0x8] sm:$0xff] }
 0xb10   :  { %2224 = vrcp.f32 %v1078_v23  ;;  %1234 = vmatpush.msra.mxu1 %v886_v51 }
 0xb11   :  { %v737_v46 = vsel %vm200_vm2, %v735_v48, 0.0 }
 0xb12   :  { %1235 = vmatpush.msra.mxu1 %v885_v32 }
 0xb13   :  { %2027 = vmatmul.msk.f32.gmra.mxu0 %vm362_vm4, %v1091_v16 }
 0xb14   :  { %1236 = vmatpush.msra.mxu1 %v884_v41 }
 0xb16   :  { %v2225_v27 = vpop.eup %2224  ;;  %1353 = vmatpush.msrb.mxu1 %v1333_v3 }
 0xb17   :  { %v1094_v28 = vmul.f32 %v2225_v27, %v2209_v30 }
 0xb18   :  { %1354 = vmatpush.msrb.mxu1 %v1332_v17 }
 0xb1a   :  { %1355 = vmatpush.msrb.mxu1 %v1331_v0 }
 0xb1b   :  { %2028 = vmatmul.msk.f32.gmra.mxu0 %vm362_vm4, %v1092_v21 }
 0xb23   :  { %2029 = vmatmul.msk.f32.gmra.mxu0 %vm362_vm4, %v1093_v26 }
 0xb2b   :  { %2030 = vmatmul.msk.f32.gmra.mxu0 %vm362_vm4, %v1094_v28 }
 0xb55   :  { %v1160_v29 = vpop.f32.mrf.mxu0 }
 0xb5d   :  { %v1163_v31 = vpop.f32.mrf.mxu0 }
 0xb80   :  { %v1166_v34 = vpop.f32.mrf.mxu0 }
 0xb81   :  { %1186 = vrot.lane.b32.xlu2 %v1166_v34, %s2406_s25 }
 0xb88   :  { %v1169_v37 = vpop.f32.mrf.mxu0 }
 0xb89   :  { %1188 = vrot.lane.b32.xlu2 %v1169_v37, %s2406_s25 }
 0xb90   :  { %v1172_v33 = vpop.f32.mrf.mxu0 }
 0xb91   :  { %1194 = vrot.lane.b32.xlu1 %v1172_v33, %s2417_s24 }
 0xb98   :  { %v1175_v40 = vpop.f32.mrf.mxu0 }
 0xba0   :  { %v1178_v42 = vpop.f32.mrf.mxu0 }
 0xba1   :  { %1202 = vrot.lane.b32.xlu0 %v1178_v42, %s2418_s30 }
 0xba8   :  { %v1181_v7 = vpop.f32.mrf.mxu0 }
 0xba9   :  { %1196 = vrot.lane.b32.xlu0 %v1175_v40, %s2417_s24  ;;  %1204 = vrot.lane.b32.xlu1 %v1181_v7, %s2418_s30  ;;  %v784_v40 = vperm.slane %v3132_v43, 7 }
 0xbb2   :  { %738 = vadd.xlane.f32.xlu2 %v737_v46 }
 0xbd3   :  { %741 = vadd.xlane.f32.xlu0 %v740_v49 }
 0xbdb   :  { %v1187_v44 = vpop.permute.xlu2 %1186 }
 0xbdc   :  { %v1208_v38 = vsel %vm272_vm3, %v1160_v29, %v1187_v44 }
 0xbe3   :  { %v1189_v54 = vpop.permute.xlu2 %1188 }
 0xbe4   :  { %v1209_v55 = vsel %vm272_vm3, %v1163_v31, %v1189_v54  ;;  %v1299_v54 = vld [vmem:[%s3512_s15 + $0x18] sm:$0xff] }
 0xbe5   :  { %1319 = vmatpush.msrb.mxu2 %v1299_v54 }
 0xc03   :  { %v1195_v50 = vpop.permute.xlu1 %1194 }
 0xc04   :  { %v1210_v39 = vsel %vm566_vm5, %v1208_v38, %v1195_v50 }
 0xc13   :  { %v1203_v52 = vpop.permute.xlu0 %1202 }
 0xc14   :  { %v1212_v53 = vsel %vm569_vm6, %v1210_v39, %v1203_v52 }
 0xc15   :  { %2031 = vmatmul.msk.f32.vlgmr.msra.gmra.mxu1 %vm200_vm2, %v1212_v53 }
 0xc1b   :  { %v1197_v30 = vpop.permute.xlu0 %1196  ;;  %v1205_v56 = vpop.permute.xlu1 %1204 }
 0xc1c   :  { %v1211_v57 = vsel %vm566_vm5, %v1209_v55, %v1197_v30 }
 0xc1d   :  { %v1213_v59 = vsel %vm569_vm6, %v1211_v57, %v1205_v56 }
 0xc1e   :  { %2032 = vmatmul.msk.f32.gmra.mxu1 %vm200_vm2, %v1213_v59 }
 0xc25   :  { %v739_v60 = vpop.xlane.xlu2 %738 }
 0xc26   :  { %v743_v62 = vmul.f32 %v739_v60, %v2824_v36  ;;  %v1334_v60 = vperm.slane %v2970_v45, 5 }
 0xc28   :  { %v745_v63 = vsub.f32 %v735_v48, %v743_v62 }
 0xc2a   :  { %v747_v1 = vmul.f32 %v745_v63, %v745_v63 }
 0xc2c   :  { %v749_v6 = vsel %vm200_vm2, %v747_v1, 0.0  ;;  %v1298_v1 = vld [vmem:[%s3512_s15 + $0x10] sm:$0xff] }
 0xc2d   :  { %750 = vadd.xlane.f32.xlu2 %v749_v6  ;;  %1320 = vmatpush.msrb.mxu2 %v1298_v1  ;;  %v1297_v6 = vld [vmem:[%s3512_s15 + $0x8] sm:$0xff] }
 0xc2f   :  { %1321 = vmatpush.msrb.mxu2 %v1297_v6 }
 0xc46   :  { %v742_v4 = vpop.xlane.xlu0 %741 }
 0xc47   :  { %v744_v11 = vmul.f32 %v742_v4, %v2824_v36 }
 0xc49   :  { %v3171_v15 = vsub.f32 %v736_v24, %v744_v11 }
 0xc4b   :  { %v748_v2 = vmul.f32 %v3171_v15, %v3171_v15 }
 0xc4d   :  { %v752_v19 = vsel %vm200_vm2, %v748_v2, 0.0 }
 0xc92   :  { %v1238_v10 = vpop.f32.mrf.mxu1 }
 0xc93   :  { %v1239_v12 = vadd.f32 %v1238_v10, %v1214_v8 }
 0xc95   :  { %v1244_v13 = vadd.f32 %v1239_v12, %v2958_v58  ;;  %v1330_v58 = vld [vmem:[%s3513_s16] sm:$0xff] }
 0xc96   :  { %1356 = vmatpush.msrb.mxu1 %v1330_v58 }
 0xc97   :  { %v1246_v9 = vsel %vm200_vm2, %v1244_v13, 0.0 }
 0xc98   :  { %1247 = vadd.xlane.f32.xlu1 %v1246_v9 }
 0xc9b   :  { %v1241_v14 = vpop.f32.mrf.mxu1 }
 0xc9c   :  { %v1242_v18 = vadd.f32 %v1241_v14, %v1214_v8  ;;  %v1296_v8 = vld [vmem:[%s3512_s15] sm:$0xff] }
 0xc9d   :  { %1322 = vmatpush.msrb.mxu2 %v1296_v8 }
 0xc9e   :  { %v1245_v16 = vadd.f32 %v1242_v18, %v2962_v35  ;;  %v781_v35 = vperm.slane %v3132_v43, 6 }
 0xca0   :  { %753 = vadd.xlane.f32.xlu1 %v752_v19  ;;  %v751_v20 = vpop.xlane.xlu2 %750  ;;  %v1249_v21 = vsel %vm200_vm2, %v1245_v16, 0.0 }
 0xca1   :  { %v755_v23 = vmul.f32 %v751_v20, %v2824_v36  ;;  %1250 = vadd.xlane.f32.xlu0 %v1249_v21 }
 0xca3   :  { %v757_v25 = vadd.f32 1e-05, %v755_v23  ;;  %v1293_v23 = vperm.slane %v2970_v45, 3 }
 0xca5   :  { %2226 = vrsqrt.f32 %v757_v25  ;;  %vm765_vm1 = vweird.f32 %v757_v25 }
 0xcab   :  { %v2227_v26 = vpop.eup %2226 }
 0xcac   :  { %v760_v27 = vmul.f32 %v2227_v26, %v757_v25  ;;  %vm766_vm0 = vweird.f32 %v2227_v26 }
 0xcad   :  { %vm767_vm7 = vmor %vm765_vm1, %vm766_vm0 }
 0xcae   :  { %v761_v28 = vmul.f32 %v2227_v26, %v760_v27 }
 0xcb0   :  { %v762_v29 = vmul.f32 0.5, %v761_v28 }
 0xcb2   :  { %v763_v31 = vsub.f32 1.5, %v762_v29 }
 0xcb4   :  { %v764_v34 = vmul.f32 %v2227_v26, %v763_v31 }
 0xcb6   :  { %v768_v37 = vsel %vm767_vm7, %v2227_v26, %v764_v34 }
 0xcb7   :  { %v779_v33 = vmul.f32 %v768_v37, %v745_v63 }
 0xcb9   :  { %v782_v42 = vmul.f32 %v781_v35, %v779_v33 }
 0xcbb   :  { %v785_v5 = vadd.f32 %v784_v40, %v782_v42 }
 0xcbd   :  { %2035 = vmatmul.msk.f32.vlgmr.msrb.gmra.mxu1 %vm200_vm2, %v785_v5  ;;  %v1300_v5 = vperm.slane %v2970_v45, 4 }
 0xd0b   :  { %v1248_v7 = vpop.xlane.xlu1 %1247 }
 0xd0c   :  { %v1252_v47 = vmul.f32 %v1248_v7, %v2824_v36 }
 0xd0e   :  { %v3193_v48 = vsub.f32 %v1244_v13, %v1252_v47 }
 0xd10   :  { %v1256_v46 = vmul.f32 %v3193_v48, %v3193_v48 }
 0xd12   :  { %v1258_v22 = vsel %vm200_vm2, %v1256_v46, 0.0 }
 0xd13   :  { %v754_v24 = vpop.xlane.xlu1 %753  ;;  %1259 = vadd.xlane.f32.xlu2 %v1258_v22 }
 0xd14   :  { %v756_v49 = vmul.f32 %v754_v24, %v2824_v36  ;;  %v1251_v61 = vpop.xlane.xlu0 %1250 }
 0xd15   :  { %v1253_v43 = vmul.f32 %v1251_v61, %v2824_v36 }
 0xd16   :  { %v758_v51 = vadd.f32 1e-05, %v756_v49 }
 0xd17   :  { %v3200_v32 = vsub.f32 %v1245_v16, %v1253_v43  ;;  %v1290_v16 = vperm.slane %v2970_v45, 2 }
 0xd18   :  { %2228 = vrsqrt.f32 %v758_v51  ;;  %vm775_vm9 = vweird.f32 %v758_v51 }
 0xd19   :  { %v1257_v41 = vmul.f32 %v3200_v32, %v3200_v32 }
 0xd1b   :  { %v1261_v44 = vsel %vm200_vm2, %v1257_v41, 0.0 }
 0xd1c   :  { %1262 = vadd.xlane.f32.xlu0 %v1261_v44 }
 0xd1e   :  { %v2229_v50 = vpop.eup %2228 }
 0xd1f   :  { %v770_v38 = vmul.f32 %v2229_v50, %v758_v51  ;;  %vm776_vm8 = vweird.f32 %v2229_v50 }
 0xd20   :  { %vm777_vm10 = vmor %vm775_vm9, %vm776_vm8 }
 0xd21   :  { %v771_v39 = vmul.f32 %v2229_v50, %v770_v38  ;;  %v1364_v38 = vld [vmem:[%s3505_s8] sm:$0xff] }
 0xd23   :  { %v772_v52 = vmul.f32 0.5, %v771_v39 }
 0xd25   :  { %v773_v53 = vsub.f32 1.5, %v772_v52 }
 0xd27   :  { %v774_v55 = vmul.f32 %v2229_v50, %v773_v53 }
 0xd29   :  { %v778_v30 = vsel %vm777_vm10, %v2229_v50, %v774_v55 }
 0xd2a   :  { %v780_v56 = vmul.f32 %v778_v30, %v3171_v15  ;;  %v1365_v30 = vld [vmem:[%s3505_s8 + $0x8] sm:$0xff] }
 0xd2c   :  { %v783_v57 = vmul.f32 %v781_v35, %v780_v56 }
 0xd2e   :  { %v786_v59 = vadd.f32 %v784_v40, %v783_v57 }
 0xd30   :  { %2036 = vmatmul.msk.f32.gmra.mxu1 %vm200_vm2, %v786_v59 }
 0xd3a   :  { %v1358_v62 = vpop.f32.mrf.mxu1 }
 0xd3b   :  { %v3211_v63 = vadd.f32 %v1358_v62, %v1334_v60  ;;  %v1366_v62 = vld [vmem:[%s3505_s8 + $0x10] sm:$0xff] }
 0xd3d   :  { %1400 = vrot.lane.b32.xlu2 %v3211_v63, %s2414_s2 }
 0xd45   :  { %1392 = vrot.lane.b32.xlu2 %v3211_v63, %s2412_s9 }
 0xd86   :  { %v1260_v4 = vpop.xlane.xlu2 %1259 }
 0xd87   :  { %v1264_v10 = vmul.f32 %v1260_v4, %v2824_v36 }
 0xd89   :  { %v1266_v11 = vadd.f32 1e-05, %v1264_v10  ;;  %v1367_v10 = vld [vmem:[%s3505_s8 + $0x18] sm:$0xff] }
 0xd8b   :  { %2230 = vrsqrt.f32 %v1266_v11  ;;  %vm1274_vm12 = vweird.f32 %v1266_v11 }
 0xd8f   :  { %v1263_v12 = vpop.xlane.xlu0 %1262 }
 0xd90   :  { %v1265_v13 = vmul.f32 %v1263_v12, %v2824_v36 }
 0xd91   :  { %v2231_v3 = vpop.eup %2230 }
 0xd92   :  { %v1269_v15 = vmul.f32 %v2231_v3, %v1266_v11  ;;  %v1267_v9 = vadd.f32 1e-05, %v1265_v13  ;;  %vm1275_vm11 = vweird.f32 %v2231_v3 }
 0xd93   :  { %vm1276_vm13 = vmor %vm1274_vm12, %vm1275_vm11 }
 0xd94   :  { %v1270_v17 = vmul.f32 %v2231_v3, %v1269_v15  ;;  %2232 = vrsqrt.f32 %v1267_v9  ;;  %vm1284_vm15 = vweird.f32 %v1267_v9 }
 0xd96   :  { %v1271_v0 = vmul.f32 0.5, %v1270_v17 }
 0xd97   :  { %v3257_v7 = vpop.permute.xlu2 %1400 }
 0xd98   :  { %v1272_v58 = vsub.f32 1.5, %v1271_v0 }
 0xd9a   :  { %v2233_v14 = vpop.eup %2232  ;;  %v1273_v2 = vmul.f32 %v2231_v3, %v1272_v58 }
 0xd9b   :  { %v1279_v18 = vmul.f32 %v2233_v14, %v1267_v9  ;;  %vm1285_vm14 = vweird.f32 %v2233_v14 }
 0xd9c   :  { %v1277_v19 = vsel %vm1276_vm13, %v2231_v3, %v1273_v2  ;;  %vm1286_vm0 = vmor %vm1284_vm15, %vm1285_vm14 }
 0xd9d   :  { %v1288_v20 = vmul.f32 %v1277_v19, %v3193_v48  ;;  %v1280_v21 = vmul.f32 %v2233_v14, %v1279_v18  ;;  %v1368_v19 = vld [vmem:[%s3505_s8 + $0x20] sm:$0xff] }
 0xd9f   :  { %v1281_v25 = vmul.f32 0.5, %v1280_v21  ;;  %v1291_v26 = vmul.f32 %v1290_v16, %v1288_v20  ;;  %v3286_v61 = vpop.permute.xlu2 %1392 }
 0xda1   :  { %v1282_v27 = vsub.f32 1.5, %v1281_v25  ;;  %v3231_v28 = vadd.f32 %v1293_v23, %v1291_v26  ;;  %v1370_v26 = vld [vmem:[%s3505_s8 + $0x30] sm:$0xff] }
 0xda3   :  { %v1283_v29 = vmul.f32 %v2233_v14, %v1282_v27  ;;  %2033 = vmatmul.msk.f32.vlgmr.msrb.gmra.mxu2 %vm200_vm2, %v3231_v28 }
 0xda5   :  { %v1287_v31 = vsel %vm1286_vm0, %v2233_v14, %v1283_v29 }
 0xda6   :  { %v1289_v34 = vmul.f32 %v1287_v31, %v3200_v32 }
 0xda8   :  { %v1292_v35 = vmul.f32 %v1290_v16, %v1289_v34  ;;  %v1369_v34 = vld [vmem:[%s3505_s8 + $0x28] sm:$0xff] }
 0xdaa   :  { %v3236_v37 = vadd.f32 %v1293_v23, %v1292_v35 }
 0xdac   :  { %2034 = vmatmul.msk.f32.gmra.mxu2 %vm200_vm2, %v3236_v37 }
 0xdad   :  { %v1361_v33 = vpop.f32.mrf.mxu1 }
 0xdae   :  { %v3240_v40 = vadd.f32 %v1361_v33, %v1334_v60 }
 0xdb0   :  { %1398 = vrot.lane.b32.xlu0 %v3240_v40, %s2413_s26  ;;  %1402 = vrot.lane.b32.xlu1 %v3240_v40, %s2414_s2 }
 0xdb8   :  { %1394 = vrot.lane.b32.xlu0 %v3240_v40, %s2412_s9  ;;  %1396 = vrot.lane.b32.xlu1 %v3211_v63, %s2413_s26 }
 0xe22   :  { %v3250_v42 = vpop.permute.xlu1 %1402  ;;  %v3263_v46 = vpop.permute.xlu0 %1398 }
 0xe23   :  { %2037 = vmatpush.xpose.msk.msra.mxu0 %vm272_vm3, %v3250_v42  ;;  %2069 = vmatpush.xpose.msk.msra.mxu2 %vm272_vm3, %v3250_v42  ;;  %v2136_v16 = vpack.i.bf16 %v3257_v7, %v3250_v42 }
 0xe26   :  { %v1324_v47 = vpop.f32.mrf.mxu2 }
 0xe27   :  { %v1325_v48 = vadd.f32 %v1324_v47, %v1300_v5  ;;  %2038 = vmatpush.xpose.msk.msra.mxu0 %vm272_vm3, %v3257_v7  ;;  %2070 = vmatpush.xpose.msk.msra.mxu2 %vm272_vm3, %v3257_v7  ;;  %v1371_v47 = vld [vmem:[%s3505_s8 + $0x38] sm:$0xff] }
 0xe29   :  { %1382 = vrot.lane.b32.xlu2 %v1325_v48, %s2413_s26  ;;  %1378 = vrot.lane.b32.xlu1 %v1325_v48, %s2412_s9 }
 0xe2a   :  { %v3271_v45 = vpop.permute.xlu1 %1396  ;;  %v3277_v49 = vpop.permute.xlu0 %1394 }
 0xe2b   :  { %2039 = vmatpush.xpose.msk.msra.mxu0 %vm272_vm3, %v3263_v46  ;;  %2071 = vmatpush.xpose.msk.msra.mxu2 %vm272_vm3, %v3263_v46  ;;  %v2141_v17 = vpack.i.bf16 %v3271_v45, %v3263_v46 }
 0xe2f   :  { %v1327_v22 = vpop.f32.mrf.mxu2  ;;  %2040 = vmatpush.xpose.msk.msra.mxu0 %vm272_vm3, %v3271_v45  ;;  %2072 = vmatpush.xpose.msk.msra.mxu2 %vm272_vm3, %v3271_v45  ;;  %v2151_v45 = vpack.i.bf16 %v3211_v63, %v3240_v40 }
 0xe30   :  { %v1328_v24 = vadd.f32 %v1327_v22, %v1300_v5  ;;  %v2146_v5 = vpack.i.bf16 %v3286_v61, %v3277_v49 }
 0xe32   :  { %1380 = vrot.lane.b32.xlu0 %v1328_v24, %s2412_s9  ;;  %1388 = vrot.lane.b32.xlu2 %v1328_v24, %s2414_s2 }
 0xe33   :  { %1384 = vrot.lane.b32.xlu1 %v1328_v24, %s2413_s26  ;;  %2041 = vmatpush.xpose.msk.msra.mxu0 %vm272_vm3, %v3277_v49 }
 0xe34   :  { %2073 = vmatpush.xpose.msk.msra.mxu2 %vm272_vm3, %v3277_v49 }
 0xe37   :  { %2042 = vmatpush.xpose.msk.msra.mxu0 %vm272_vm3, %v3286_v61 }
 0xe38   :  { %2074 = vmatpush.xpose.msk.msra.mxu2 %vm272_vm3, %v3286_v61 }
 0xe3a   :  { %1386 = vrot.lane.b32.xlu0 %v1325_v48, %s2414_s2 }
 0xe3b   :  { %2043 = vmatpush.xpose.msk.msra.mxu0 %vm272_vm3, %v3240_v40 }
 0xe3c   :  { %2075 = vmatpush.xpose.msk.msra.mxu2 %vm272_vm3, %v3240_v40 }
 0xe3f   :  { %2044 = vmatpush.xpose.msk.msra.mxu0 %vm272_vm3, %v3211_v63 }
 0xe40   :  { %2076 = vmatpush.xpose.msk.msra.mxu2 %vm272_vm3, %v3211_v63 }
 0xe42   :  { %2045 = vmatmul.msk.f32.vlgmr.msra.gmra.mxu0 %vm272_vm3, %v1325_v48 }
 0xe43   :  { %2046 = vmatmul.msk.f32.vlgmr.msra.gmra.mxu2 %vm272_vm3, %v1328_v24 }
 0xe83   :  { %v1383_v32 = vpop.permute.xlu2 %1382 }
 0xe8c   :  { %v1389_v53 = vpop.permute.xlu2 %1388 }
 0xe9b   :  { %v1379_v43 = vpop.permute.xlu1 %1378 }
 0xe9c   :  { %2047 = vmatmul.msk.f32.gmra.mxu2 %vm272_vm3, %v1379_v43 }
 0xea4   :  { %v1381_v51 = vpop.permute.xlu0 %1380 }
 0xea5   :  { %2048 = vmatmul.msk.f32.gmra.mxu2 %vm272_vm3, %v1381_v51  ;;  %v1385_v41 = vpop.permute.xlu1 %1384 }
 0xeac   :  { %v1387_v44 = vpop.permute.xlu0 %1386 }
 0xead   :  { %2049 = vmatmul.msk.f32.gmra.mxu2 %vm272_vm3, %v1383_v32 }
 0xeb5   :  { %2050 = vmatmul.msk.f32.gmra.mxu2 %vm272_vm3, %v1385_v41 }
 0xebd   :  { %2051 = vmatmul.msk.f32.gmra.mxu2 %vm272_vm3, %v1387_v44 }
 0xebf   :  { %v1453_v50 = vpop.f32.mrf.mxu0 }
 0xec0   :  { %v1477_v39 = vmul.f32 0.35355338, %v1453_v50 }
 0xec2   :  { %v1485_v52 = vadd.f32 %v1477_v39, %v1364_v38 }
 0xec4   :  { %v1493_v54 = vsel %vm362_vm4, %v1485_v52, -inf }
 0xec5   :  { %1494 = vmax.xlane.f32.xlu1 %v1493_v54  ;;  %2052 = vmatmul.msk.f32.gmra.mxu2 %vm272_vm3, %v1389_v53 }
 0xec6   :  { %v1456_v55 = vpop.f32.mrf.mxu2 }
 0xec7   :  { %v1478_v56 = vmul.f32 0.35355338, %v1456_v55 }
 0xec9   :  { %v1486_v57 = vadd.f32 %v1478_v56, %v1365_v30 }
 0xecb   :  { %v1496_v59 = vsel %vm362_vm4, %v1486_v57, -inf }
 0xecc   :  { %1497 = vmax.xlane.f32.xlu0 %v1496_v59 }
 0xf1f   :  { %v1459_v60 = vpop.f32.mrf.mxu2 }
 0xf20   :  { %v1479_v1 = vmul.f32 0.35355338, %v1459_v60 }
 0xf22   :  { %v1487_v6 = vadd.f32 %v1479_v1, %v1366_v62 }
 0xf24   :  { %v1499_v8 = vsel %vm362_vm4, %v1487_v6, -inf }
 0xf25   :  { %1500 = vmax.xlane.f32.xlu2 %v1499_v8 }
 0xf28   :  { %v1462_v4 = vpop.f32.mrf.mxu2 }
 0xf29   :  { %v1480_v11 = vmul.f32 0.35355338, %v1462_v4 }
 0xf2b   :  { %v1488_v12 = vadd.f32 %v1480_v11, %v1367_v10 }
 0xf2d   :  { %v1502_v13 = vsel %vm362_vm4, %v1488_v12, -inf }
 0xf2e   :  { %1503 = vmax.xlane.f32.xlu1 %v1502_v13 }
 0xf30   :  { %v1465_v3 = vpop.f32.mrf.mxu2 }
 0xf31   :  { %v1481_v2 = vmul.f32 0.35355338, %v1465_v3 }
 0xf33   :  { %v1489_v20 = vadd.f32 %v1481_v2, %v1368_v19 }
 0xf35   :  { %v1505_v25 = vsel %vm362_vm4, %v1489_v20, -inf }
 0xf38   :  { %v1495_v15 = vpop.xlane.xlu1 %1494  ;;  %v1468_v58 = vpop.f32.mrf.mxu2 }
 0xf39   :  { %v1517_v9 = vsub.f32 %v1485_v52, %v1495_v15  ;;  %v1482_v31 = vmul.f32 0.35355338, %v1468_v58 }
 0xf3b   :  { %v1525_v0 = vmul.f32 1.442695, %v1517_v9  ;;  %v3346_v35 = vadd.f32 %v1482_v31, %v1369_v34 }
 0xf3d   :  { %2234 = vpow2.f32 %v1525_v0  ;;  %2142 = vrot.lane.b32.xlu2 %v2141_v17, %s2415_s3  ;;  %v1508_v42 = vsel %vm362_vm4, %v3346_v35, -inf }
 0xf3f   :  { %v1498_v22 = vpop.xlane.xlu0 %1497 }
 0xf40   :  { %v1471_v21 = vpop.f32.mrf.mxu2  ;;  %v1518_v24 = vsub.f32 %v1486_v57, %v1498_v22 }
 0xf41   :  { %v1483_v23 = vmul.f32 0.35355338, %v1471_v21 }
 0xf42   :  { %v1527_v49 = vmul.f32 1.442695, %v1518_v24 }
 0xf43   :  { %v3328_v14 = vpop.eup %2234  ;;  %v1491_v27 = vadd.f32 %v1483_v23, %v1370_v26 }
 0xf44   :  { %v1541_v18 = vsel %vm362_vm4, %v3328_v14, 0.0  ;;  %2236 = vpow2.f32 %v1527_v49 }
 0xf45   :  { %1542 = vadd.xlane.f32.xlu0 %v1541_v18  ;;  %v1511_v29 = vsel %vm362_vm4, %v1491_v27, -inf }
 0xf47   :  { %2137 = vrot.lane.b32.xlu1 %v2136_v16, %s2415_s3 }
 0xf48   :  { %v1474_v33 = vpop.f32.mrf.mxu2 }
 0xf49   :  { %v1484_v7 = vmul.f32 0.35355338, %v1474_v33 }
 0xf4a   :  { %v3363_v41 = vpop.eup %2236 }
 0xf4b   :  { %v3356_v48 = vadd.f32 %v1484_v7, %v1371_v47  ;;  %v1544_v40 = vsel %vm362_vm4, %v3363_v41, 0.0 }
 0xf4d   :  { %1506 = vmax.xlane.f32.xlu0 %v1505_v25  ;;  %v1514_v46 = vsel %vm362_vm4, %v3356_v48, -inf }
 0xf55   :  { %1512 = vmax.xlane.f32.xlu0 %v1511_v29 }
 0xf66   :  { %1509 = vmax.xlane.f32.xlu2 %v1508_v42 }
 0xf69   :  { %2147 = vrot.lane.b32.xlu0 %v2146_v5, %s2415_s3 }
 0xf71   :  { %1515 = vmax.xlane.f32.xlu1 %v1514_v46 }
 0xf7e   :  { %2152 = vrot.lane.b32.xlu2 %v2151_v45, %s2415_s3 }
 0xf98   :  { %v1501_v61 = vpop.xlane.xlu2 %1500 }
 0xf99   :  { %v1519_v43 = vsub.f32 %v1487_v6, %v1501_v61 }
 0xf9b   :  { %v1529_v51 = vmul.f32 1.442695, %v1519_v43 }
 0xf9d   :  { %2238 = vpow2.f32 %v1529_v51 }
 0xfa0   :  { %v2143_v30 = vpop.permute.xlu2 %2142 }
 0xfa1   :  { %v1504_v32 = vpop.xlane.xlu1 %1503  ;;  %v2144_v57 = vunpack.i.l.bf16 %v2143_v30  ;;  %v2145_v59 = vunpack.i.h.bf16 %v2143_v30  ;;  %v1375_v30 = vld [vmem:[%s3514_s17 + $0x18] sm:$0xff] }
 0xfa2   :  { %v1520_v44 = vsub.f32 %v1488_v12, %v1504_v32  ;;  %1719 = vmatpush.msrb.mxu0 %v1375_v30 }
 0xfa3   :  { %v3365_v50 = vpop.eup %2238 }
 0xfa4   :  { %v1531_v38 = vmul.f32 1.442695, %v1520_v44  ;;  %v1547_v63 = vsel %vm362_vm4, %v3365_v50, 0.0 }
 0xfa5   :  { %1548 = vadd.xlane.f32.xlu0 %v1547_v63 }
 0xfa6   :  { %2240 = vpow2.f32 %v1531_v38 }
 0xfa7   :  { %1545 = vadd.xlane.f32.xlu2 %v1544_v40 }
 0xfac   :  { %v3371_v39 = vpop.eup %2240 }
 0xfad   :  { %v1550_v52 = vsel %vm362_vm4, %v3371_v39, 0.0 }
 0xfae   :  { %1551 = vadd.xlane.f32.xlu1 %v1550_v52 }
 0xfb8   :  { %v1543_v53 = vpop.xlane.xlu0 %1542 }
 0xfb9   :  { %v2138_v54 = vpop.permute.xlu1 %2137 }
 0xfba   :  { %v2139_v55 = vunpack.i.l.bf16 %v2138_v54  ;;  %v2140_v56 = vunpack.i.h.bf16 %v2138_v54 }
 0xfbc   :  { %1637 = vmatpush.msra.mxu1 %v2139_v55 }
 0xfbe   :  { %1638 = vmatpush.msra.mxu1 %v2140_v56  ;;  %v1374_v56 = vld [vmem:[%s3514_s17 + $0x10] sm:$0xff] }
 0xfbf   :  { %1720 = vmatpush.msrb.mxu0 %v1374_v56 }
 0xfc0   :  { %v1507_v60 = vpop.xlane.xlu0 %1506  ;;  %1639 = vmatpush.msra.mxu1 %v2144_v57  ;;  %v1373_v57 = vld [vmem:[%s3514_s17 + $0x8] sm:$0xff] }
 0xfc1   :  { %v1521_v62 = vsub.f32 %v1489_v20, %v1507_v60  ;;  %1721 = vmatpush.msrb.mxu0 %v1373_v57 }
 0xfc2   :  { %1640 = vmatpush.msra.mxu1 %v2145_v59  ;;  %v1372_v59 = vld [vmem:[%s3514_s17] sm:$0xff]  ;;  %s3540_s17 = smov 128  }
 0xfc3   :  { %v1533_v1 = vmul.f32 1.442695, %v1521_v62  ;;  %1722 = vmatpush.msrb.mxu0 %v1372_v59 }
 0xfc5   :  { %2242 = vpow2.f32 %v1533_v1 }
 0xfc8   :  { %v1513_v6 = vpop.xlane.xlu0 %1512 }
 0xfc9   :  { %v1523_v8 = vsub.f32 %v1491_v27, %v1513_v6 }
 0xfcb   :  { %v2243_v4 = vpop.eup %2242  ;;  %v1537_v10 = vmul.f32 1.442695, %v1523_v8 }
 0xfcc   :  { %v1553_v11 = vsel %vm362_vm4, %v2243_v4, 0.0 }
 0xfcd   :  { %2244 = vpow2.f32 %v1537_v10  ;;  %1554 = vadd.xlane.f32.xlu1 %v1553_v11 }
 0xfce   :  { %2246 = vrcp.f32 %v1543_v53 }
 0xfd3   :  { %v2245_v12 = vpop.eup %2244 }
 0xfd4   :  { %v1559_v13 = vsel %vm362_vm4, %v2245_v12, 0.0  ;;  %v2247_v18 = vpop.eup %2246 }
 0xfd5   :  { %1560 = vadd.xlane.f32.xlu0 %v1559_v13  ;;  %v1573_v23 = vmul.f32 %v2247_v18, %v3328_v14 }
 0xfd9   :  { %v1510_v3 = vpop.xlane.xlu2 %1509 }
 0xfda   :  { %v1522_v15 = vsub.f32 %v3346_v35, %v1510_v3 }
 0xfdb   :  { %v2148_v9 = vpop.permute.xlu0 %2147 }
 0xfdc   :  { %v1535_v17 = vmul.f32 1.442695, %v1522_v15  ;;  %v2149_v0 = vunpack.i.l.bf16 %v2148_v9  ;;  %v2150_v58 = vunpack.i.h.bf16 %v2148_v9  ;;  %v3419_v9 = vld [vmem:[#allocation8 + $0x8] sm:$0xff] }
 0xfde   :  { %2248 = vpow2.f32 %v1535_v17  ;;  %1641 = vmatpush.msra.mxu1 %v2149_v0  ;;  %v1700_v17 = vperm.slane %v3419_v9, 6 }
 0xfe0   :  { %1642 = vmatpush.msra.mxu1 %v2150_v58 }
 0xfe1   :  { %v2153_v2 = vpop.permute.xlu2 %2152 }
 0xfe2   :  { %v2154_v16 = vunpack.i.l.bf16 %v2153_v2  ;;  %v2155_v20 = vunpack.i.h.bf16 %v2153_v2 }
 0xfe4   :  { %v2249_v19 = vpop.eup %2248  ;;  %v1516_v21 = vpop.xlane.xlu1 %1515  ;;  %1643 = vmatpush.msra.mxu1 %v2154_v16 }
 0xfe5   :  { %v1524_v25 = vsub.f32 %v3356_v48, %v1516_v21  ;;  %v1556_v26 = vsel %vm362_vm4, %v2249_v19, 0.0 }
 0xfe6   :  { %1557 = vadd.xlane.f32.xlu2 %v1556_v26  ;;  %1644 = vmatpush.msra.mxu1 %v2155_v20 }
 0xfe7   :  { %v1539_v27 = vmul.f32 1.442695, %v1524_v25  ;;  %2053 = vmatmul.msk.f32.vlgmr.msra.gmra.mxu1 %vm362_vm4, %v1573_v23  ;;  %v1785_v23 = vld [vmem:[%s3515_s18 + $0x18] sm:$0xff] }
 0xfe8   :  { %1805 = vmatpush.msra.mxu3 %v1785_v23 }
 0xfe9   :  { %2250 = vpow2.f32 %v1539_v27 }
 0xfef   :  { %v2251_v29 = vpop.eup %2250 }
 0xff0   :  { %v1562_v31 = vsel %vm362_vm4, %v2251_v29, 0.0 }
 0xff1   :  { %1563 = vadd.xlane.f32.xlu1 %v1562_v31 }
0x1018   :  { %v1549_v35 = vpop.xlane.xlu0 %1548 }
0x101a   :  { %v1546_v34 = vpop.xlane.xlu2 %1545 }
0x101b   :  { %2252 = vrcp.f32 %v1546_v34 }
0x101c   :  { %2254 = vrcp.f32 %v1549_v35 }
0x1021   :  { %v2253_v33 = vpop.eup %2252  ;;  %v1552_v42 = vpop.xlane.xlu1 %1551 }
0x1022   :  { %v1574_v14 = vmul.f32 %v2253_v33, %v3363_v41  ;;  %v2255_v5 = vpop.eup %2254  ;;  %2256 = vrcp.f32 %v1552_v42  ;;  %v1783_v42 = vld [vmem:[%s3515_s18 + $0x8] sm:$0xff] }
0x1023   :  { %v1575_v7 = vmul.f32 %v2255_v5, %v3365_v50  ;;  %v1782_v5 = vld [vmem:[%s3515_s18] sm:$0xff] }
0x1024   :  { %2054 = vmatmul.msk.f32.gmra.mxu1 %vm362_vm4, %v1574_v14  ;;  %v1784_v14 = vld [vmem:[%s3515_s18 + $0x10] sm:$0xff] }
0x1025   :  { %1806 = vmatpush.msra.mxu3 %v1784_v14 }
0x1027   :  { %1807 = vmatpush.msra.mxu3 %v1783_v42 }
0x1028   :  { %v2257_v47 = vpop.eup %2256 }
0x1029   :  { %v1576_v48 = vmul.f32 %v2257_v47, %v3371_v39  ;;  %1808 = vmatpush.msra.mxu3 %v1782_v5 }
0x102c   :  { %2055 = vmatmul.msk.f32.gmra.mxu1 %vm362_vm4, %v1575_v7 }
0x1034   :  { %2056 = vmatmul.msk.f32.gmra.mxu1 %vm362_vm4, %v1576_v48 }
0x1040   :  { %v1555_v46 = vpop.xlane.xlu1 %1554 }
0x1041   :  { %2258 = vrcp.f32 %v1555_v46  ;;  %v1825_v46 = vld [vmem:[%s3516_s19 + $0x38] sm:$0xff] }
0x1042   :  { %1841 = vmatpush.msra.mxu0 %v1825_v46  ;;  %v1908_v46 = vld [vmem:[#allocation7] sm:$0xff] }
0x1047   :  { %v2259_v45 = vpop.eup %2258 }
0x1048   :  { %v1577_v22 = vmul.f32 %v2259_v45, %v2243_v4  ;;  %v1561_v49 = vpop.xlane.xlu0 %1560  ;;  %v1824_v45 = vld [vmem:[%s3516_s19 + $0x30] sm:$0xff] }
0x1049   :  { %1842 = vmatpush.msra.mxu0 %v1824_v45 }
0x104a   :  { %2057 = vmatmul.msk.f32.gmra.mxu1 %vm362_vm4, %v1577_v22  ;;  %v1823_v22 = vld [vmem:[%s3516_s19 + $0x28] sm:$0xff] }
0x104b   :  { %1843 = vmatpush.msra.mxu0 %v1823_v22 }
0x1059   :  { %v1558_v24 = vpop.xlane.xlu2 %1557 }
0x105a   :  { %2260 = vrcp.f32 %v1558_v24 }
0x105b   :  { %2262 = vrcp.f32 %v1561_v49 }
0x1060   :  { %v2261_v61 = vpop.eup %2260 }
0x1061   :  { %v1578_v43 = vmul.f32 %v2261_v61, %v2249_v19  ;;  %v2263_v32 = vpop.eup %2262  ;;  %v1822_v61 = vld [vmem:[%s3516_s19 + $0x20] sm:$0xff] }
0x1062   :  { %v1579_v41 = vmul.f32 %v2263_v32, %v2245_v12  ;;  %v1821_v32 = vld [vmem:[%s3516_s19 + $0x18] sm:$0xff]  ;;  %1844 = vmatpush.msra.mxu0 %v1822_v61 }
0x1063   :  { %2058 = vmatmul.msk.f32.gmra.mxu1 %vm362_vm4, %v1578_v43 }
0x1064   :  { %v1564_v51 = vpop.xlane.xlu1 %1563  ;;  %v1646_v38 = vpop.f32.mrf.mxu1  ;;  %1845 = vmatpush.msra.mxu0 %v1821_v32 }
0x1065   :  { %2264 = vrcp.f32 %v1564_v51 }
0x106b   :  { %2059 = vmatmul.msk.f32.gmra.mxu1 %vm362_vm4, %v1579_v41  ;;  %v2265_v44 = vpop.eup %2264 }
0x106c   :  { %v1580_v50 = vmul.f32 %v2265_v44, %v2251_v29 }
0x1073   :  { %2060 = vmatmul.msk.f32.gmra.mxu1 %vm362_vm4, %v1580_v50 }
0x10a1   :  { %v1649_v63 = vpop.f32.mrf.mxu1 }
0x10a9   :  { %v1652_v40 = vpop.f32.mrf.mxu1 }
0x10aa   :  { %1672 = vrot.lane.b32.xlu2 %v1652_v40, %s2406_s25 }
0x10b1   :  { %v1655_v39 = vpop.f32.mrf.mxu1 }
0x10c7   :  { %v1658_v52 = vpop.f32.mrf.mxu1 }
0x10c8   :  { %1680 = vrot.lane.b32.xlu0 %v1658_v52, %s2417_s24  ;;  %v3459_v52 = vld [vmem:[#allocation8 + $0x10] sm:$0x3f] }
0x10c9   :  { %v1779_v56 = vperm.slane %v3459_v52, 0 }
0x10d0   :  { %1674 = vrot.lane.b32.xlu0 %v1655_v39, %s2406_s25 }
0x10e0   :  { %v1661_v53 = vpop.f32.mrf.mxu1 }
0x10e1   :  { %1682 = vrot.lane.b32.xlu2 %v1661_v53, %s2417_s24  ;;  %v1776_v53 = vperm.slane %v3419_v9, 7 }
0x10e8   :  { %v1664_v54 = vpop.f32.mrf.mxu1 }
0x10e9   :  { %1688 = vrot.lane.b32.xlu1 %v1664_v54, %s2418_s30 }
0x10f0   :  { %v1667_v55 = vpop.f32.mrf.mxu1 }
0x10f1   :  { %1690 = vrot.lane.b32.xlu0 %v1667_v55, %s2418_s30 }
0x1104   :  { %v1673_v62 = vpop.permute.xlu2 %1672 }
0x1105   :  { %v1694_v1 = vsel %vm272_vm3, %v1646_v38, %v1673_v62 }
0x113a   :  { %v1681_v60 = vpop.permute.xlu0 %1680 }
0x113b   :  { %v1696_v6 = vsel %vm566_vm5, %v1694_v1, %v1681_v60  ;;  %v1683_v12 = vpop.permute.xlu2 %1682 }
0x1142   :  { %v1675_v8 = vpop.permute.xlu0 %1674 }
0x1143   :  { %v1695_v11 = vsel %vm272_vm3, %v1649_v63, %v1675_v8 }
0x1144   :  { %v1697_v3 = vsel %vm566_vm5, %v1695_v11, %v1683_v12  ;;  %v1820_v11 = vld [vmem:[%s3516_s19 + $0x10] sm:$0xff]  ;;  %v1819_v12 = vld [vmem:[%s3516_s19 + $0x8] sm:$0xff] }
0x1145   :  { %1846 = vmatpush.msra.mxu0 %v1820_v11 }
0x1147   :  { %1847 = vmatpush.msra.mxu0 %v1819_v12 }
0x115b   :  { %v1689_v4 = vpop.permute.xlu1 %1688 }
0x115c   :  { %v1698_v10 = vsel %vm569_vm6, %v1696_v6, %v1689_v4 }
0x115d   :  { %2061 = vmatmul.msk.f32.vlgmr.msrb.gmra.mxu0 %vm200_vm2, %v1698_v10 }
0x1163   :  { %v1691_v13 = vpop.permute.xlu0 %1690 }
0x1164   :  { %v1699_v15 = vsel %vm569_vm6, %v1697_v3, %v1691_v13  ;;  %v1818_v13 = vld [vmem:[%s3516_s19] sm:$0xff]  ;;  %v1786_v3 = vperm.slane %v3459_v52, 1  ;;  %s2420_s19 = smov [#allocation10]  }
0x1165   :  { %2062 = vmatmul.msk.f32.gmra.mxu0 %vm200_vm2, %v1699_v15  ;;  %s1948_s5 = sshll.u32 %s2420_s19, 4  ;;  %s1949_s5 = int_to_ptr.vmem [resolvable:$true] %s1948_s5 }
0x1166   :  { %1848 = vmatpush.msra.mxu0 %v1818_v13 }
0x11da   :  { %v1724_v0 = vpop.f32.mrf.mxu0 }
0x11db   :  { %v1725_v58 = vadd.f32 %v1724_v0, %v1700_v17 }
0x11dd   :  { %v1730_v2 = vadd.f32 %v1725_v58, %v3231_v28 }
0x11df   :  { %v1732_v18 = vsel %vm200_vm2, %v1730_v2, 0.0 }
0x11e0   :  { %1733 = vadd.xlane.f32.xlu1 %v1732_v18  ;;  %v1826_v18 = vperm.slane %v3459_v52, 2 }
0x11e2   :  { %v1727_v16 = vpop.f32.mrf.mxu0 }
0x11e3   :  { %v1728_v19 = vadd.f32 %v1727_v16, %v1700_v17 }
0x11e5   :  { %v1731_v20 = vadd.f32 %v1728_v19, %v3236_v37 }
0x11e7   :  { %v1735_v21 = vsel %vm200_vm2, %v1731_v20, 0.0 }
0x11e8   :  { %1736 = vadd.xlane.f32.xlu2 %v1735_v21 }
0x1253   :  { %v1734_v25 = vpop.xlane.xlu1 %1733 }
0x1254   :  { %v1738_v26 = vmul.f32 %v1734_v25, %v2824_v36 }
0x1256   :  { %v1740_v27 = vsub.f32 %v1730_v2, %v1738_v26 }
0x1258   :  { %v1742_v28 = vmul.f32 %v1740_v27, %v1740_v27 }
0x125a   :  { %v1744_v29 = vsel %vm200_vm2, %v1742_v28, 0.0 }
0x125b   :  { %1745 = vadd.xlane.f32.xlu0 %v1744_v29  ;;  %v1737_v31 = vpop.xlane.xlu2 %1736 }
0x125c   :  { %v1739_v34 = vmul.f32 %v1737_v31, %v2824_v36 }
0x125e   :  { %v1741_v37 = vsub.f32 %v1731_v20, %v1739_v34 }
0x1260   :  { %v1743_v35 = vmul.f32 %v1741_v37, %v1741_v37 }
0x1262   :  { %v1747_v33 = vsel %vm200_vm2, %v1743_v35, 0.0 }
0x1263   :  { %1748 = vadd.xlane.f32.xlu2 %v1747_v33 }
0x12ce   :  { %v1746_v7 = vpop.xlane.xlu0 %1745 }
0x12cf   :  { %v1750_v47 = vmul.f32 %v1746_v7, %v2824_v36  ;;  %v1911_v7 = vld [vmem:[#allocation7 + $0x18] sm:$0xff] }
0x12d0   :  { %1931 = vmatpush.msrb.mxu3 %v1911_v7 }
0x12d1   :  { %v1752_v48 = vadd.f32 1e-05, %v1750_v47  ;;  %v1910_v47 = vld [vmem:[#allocation7 + $0x10] sm:$0xff] }
0x12d2   :  { %1932 = vmatpush.msrb.mxu3 %v1910_v47 }
0x12d3   :  { %2266 = vrsqrt.f32 %v1752_v48  ;;  %vm1760_vm5 = vweird.f32 %v1752_v48 }
0x12d6   :  { %v1749_v24 = vpop.xlane.xlu2 %1748 }
0x12d7   :  { %v1751_v49 = vmul.f32 %v1749_v24, %v2824_v36 }
0x12d9   :  { %v2267_v43 = vpop.eup %2266  ;;  %v1753_v51 = vadd.f32 1e-05, %v1751_v49 }
0x12da   :  { %v1755_v41 = vmul.f32 %v2267_v43, %v1752_v48  ;;  %vm1761_vm3 = vweird.f32 %v2267_v43  ;;  %v1909_v48 = vld [vmem:[#allocation7 + $0x8] sm:$0xff] }
0x12db   :  { %2268 = vrsqrt.f32 %v1753_v51  ;;  %vm1762_vm6 = vmor %vm1760_vm5, %vm1761_vm3  ;;  %vm1770_vm7 = vweird.f32 %v1753_v51  ;;  %1933 = vmatpush.msrb.mxu3 %v1909_v48 }
0x12dc   :  { %v1756_v44 = vmul.f32 %v2267_v43, %v1755_v41 }
0x12dd   :  { %1934 = vmatpush.msrb.mxu3 %v1908_v46 }
0x12de   :  { %v1757_v50 = vmul.f32 0.5, %v1756_v44 }
0x12e0   :  { %v1758_v38 = vsub.f32 1.5, %v1757_v50 }
0x12e1   :  { %v2269_v63 = vpop.eup %2268 }
0x12e2   :  { %v1759_v40 = vmul.f32 %v2267_v43, %v1758_v38  ;;  %v1765_v39 = vmul.f32 %v2269_v63, %v1753_v51  ;;  %vm1771_vm1 = vweird.f32 %v2269_v63 }
0x12e3   :  { %vm1772_vm8 = vmor %vm1770_vm7, %vm1771_vm1 }
0x12e4   :  { %v1763_v54 = vsel %vm1762_vm6, %v2267_v43, %v1759_v40  ;;  %v1766_v55 = vmul.f32 %v2269_v63, %v1765_v39  ;;  %v1902_v39 = vperm.slane %v3459_v52, 3 }
0x12e5   :  { %v1774_v30 = vmul.f32 %v1763_v54, %v1740_v27 }
0x12e6   :  { %v1767_v57 = vmul.f32 0.5, %v1766_v55 }
0x12e7   :  { %v1777_v59 = vmul.f32 %v1776_v53, %v1774_v30 }
0x12e8   :  { %v1768_v60 = vsub.f32 1.5, %v1767_v57 }
0x12e9   :  { %v1780_v62 = vadd.f32 %v1779_v56, %v1777_v59 }
0x12ea   :  { %v1769_v1 = vmul.f32 %v2269_v63, %v1768_v60 }
0x12eb   :  { %2063 = vmatmul.msk.f32.vlgmr.msra.gmra.mxu3 %vm200_vm2, %v1780_v62 }
0x12ec   :  { %v1773_v6 = vsel %vm1772_vm8, %v2269_v63, %v1769_v1 }
0x12ed   :  { %v1775_v8 = vmul.f32 %v1773_v6, %v1741_v37 }
0x12ef   :  { %v1778_v4 = vmul.f32 %v1776_v53, %v1775_v8 }
0x12f1   :  { %v1781_v10 = vadd.f32 %v1779_v56, %v1778_v4  ;;  %v1912_v4 = vperm.slane %v3459_v52, 5 }
0x12f3   :  { %2064 = vmatmul.msk.f32.gmra.mxu3 %vm200_vm2, %v1781_v10 }
0x136e   :  { %v1810_v15 = vpop.f32.mrf.mxu3 }
0x136f   :  { %v1811_v9 = vadd.f32 %v1810_v15, %v1786_v3 }
0x1371   :  { %v1816_v17 = vmax.f32 %v1811_v9, 0.0 }
0x1373   :  { %2065 = vmatmul.msk.f32.vlgmr.msra.gmra.mxu0 %vm362_vm4, %v1816_v17 }
0x1376   :  { %v1813_v0 = vpop.f32.mrf.mxu3 }
0x1377   :  { %v1814_v58 = vadd.f32 %v1813_v0, %v1786_v3 }
0x1379   :  { %v1817_v2 = vmax.f32 %v1814_v58, 0.0 }
0x137b   :  { %2066 = vmatmul.msk.f32.gmra.mxu0 %vm362_vm4, %v1817_v2 }
0x13f0   :  { %v1850_v16 = vpop.f32.mrf.mxu0 }
0x13f1   :  { %v1851_v19 = vadd.f32 %v1850_v16, %v1826_v18 }
0x13f3   :  { %v1856_v20 = vadd.f32 %v1851_v19, %v1780_v62 }
0x13f5   :  { %v1858_v21 = vsel %vm200_vm2, %v1856_v20, 0.0 }
0x13f6   :  { %1859 = vadd.xlane.f32.xlu1 %v1858_v21 }
0x13f8   :  { %v1853_v23 = vpop.f32.mrf.mxu0 }
0x13f9   :  { %v1854_v25 = vadd.f32 %v1853_v23, %v1826_v18 }
0x13fb   :  { %v1857_v26 = vadd.f32 %v1854_v25, %v1781_v10 }
0x13fd   :  { %v1861_v27 = vsel %vm200_vm2, %v1857_v26, 0.0 }
0x13fe   :  { %1862 = vadd.xlane.f32.xlu2 %v1861_v27 }
0x1469   :  { %v1860_v28 = vpop.xlane.xlu1 %1859 }
0x146a   :  { %v1864_v29 = vmul.f32 %v1860_v28, %v2824_v36 }
0x146c   :  { %v1866_v31 = vsub.f32 %v1856_v20, %v1864_v29 }
0x146e   :  { %v1868_v34 = vmul.f32 %v1866_v31, %v1866_v31 }
0x1470   :  { %v1870_v37 = vsel %vm200_vm2, %v1868_v34, 0.0 }
0x1471   :  { %v1863_v35 = vpop.xlane.xlu2 %1862  ;;  %1871 = vadd.xlane.f32.xlu0 %v1870_v37 }
0x1472   :  { %v1865_v33 = vmul.f32 %v1863_v35, %v2824_v36 }
0x1474   :  { %v1867_v14 = vsub.f32 %v1857_v26, %v1865_v33 }
0x1476   :  { %v1869_v42 = vmul.f32 %v1867_v14, %v1867_v14 }
0x1478   :  { %v1873_v5 = vsel %vm200_vm2, %v1869_v42, 0.0 }
0x1479   :  { %1874 = vadd.xlane.f32.xlu1 %v1873_v5 }
0x14e4   :  { %v1872_v45 = vpop.xlane.xlu0 %1871 }
0x14e5   :  { %v1876_v22 = vmul.f32 %v1872_v45, %v2824_v36 }
0x14e7   :  { %v1878_v24 = vadd.f32 1e-05, %v1876_v22 }
0x14e9   :  { %2270 = vrsqrt.f32 %v1878_v24  ;;  %vm1886_vm9 = vweird.f32 %v1878_v24 }
0x14ec   :  { %v1875_v49 = vpop.xlane.xlu1 %1874 }
0x14ed   :  { %v1877_v61 = vmul.f32 %v1875_v49, %v2824_v36  ;;  %v1905_v36 = vperm.slane %v3459_v52, 4 }
0x14ef   :  { %v2271_v43 = vpop.eup %2270  ;;  %v1879_v51 = vadd.f32 1e-05, %v1877_v61 }
0x14f0   :  { %v1881_v32 = vmul.f32 %v2271_v43, %v1878_v24  ;;  %vm1887_vm4 = vweird.f32 %v2271_v43 }
0x14f1   :  { %2272 = vrsqrt.f32 %v1879_v51  ;;  %vm1888_vm10 = vmor %vm1886_vm9, %vm1887_vm4  ;;  %vm1896_vm12 = vweird.f32 %v1879_v51 }
0x14f2   :  { %v1882_v41 = vmul.f32 %v2271_v43, %v1881_v32 }
0x14f4   :  { %v1883_v44 = vmul.f32 0.5, %v1882_v41 }
0x14f6   :  { %v1884_v50 = vsub.f32 1.5, %v1883_v44 }
0x14f7   :  { %v2273_v38 = vpop.eup %2272 }
0x14f8   :  { %v1885_v63 = vmul.f32 %v2271_v43, %v1884_v50  ;;  %v1891_v40 = vmul.f32 %v2273_v38, %v1879_v51  ;;  %vm1897_vm11 = vweird.f32 %v2273_v38 }
0x14f9   :  { %vm1898_vm13 = vmor %vm1896_vm12, %vm1897_vm11 }
0x14fa   :  { %v1889_v53 = vsel %vm1888_vm10, %v2271_v43, %v1885_v63  ;;  %v1892_v54 = vmul.f32 %v2273_v38, %v1891_v40 }
0x14fb   :  { %v1900_v55 = vmul.f32 %v1889_v53, %v1866_v31 }
0x14fc   :  { %v1893_v30 = vmul.f32 0.5, %v1892_v54 }
0x14fd   :  { %v1903_v56 = vmul.f32 %v1902_v39, %v1900_v55 }
0x14fe   :  { %v1894_v57 = vsub.f32 1.5, %v1893_v30 }
0x14ff   :  { %v1906_v59 = vadd.f32 %v1905_v36, %v1903_v56 }
0x1500   :  { %v1895_v60 = vmul.f32 %v2273_v38, %v1894_v57 }
0x1501   :  { %2067 = vmatmul.msk.f32.vlgmr.msrb.gmra.mxu3 %vm200_vm2, %v1906_v59 }
0x1502   :  { %v1899_v62 = vsel %vm1898_vm13, %v2273_v38, %v1895_v60 }
0x1503   :  { %v1901_v1 = vmul.f32 %v1899_v62, %v1867_v14 }
0x1505   :  { %v1904_v6 = vmul.f32 %v1902_v39, %v1901_v1 }
0x1507   :  { %v1907_v8 = vadd.f32 %v1905_v36, %v1904_v6 }
0x1509   :  { %2068 = vmatmul.msk.f32.gmra.mxu3 %vm200_vm2, %v1907_v8 }
0x1584   :  { %v1936_v10 = vpop.f32.mrf.mxu3 }
0x1585   :  { %v1937_v11 = vadd.f32 %v1936_v10, %v1912_v4 }
0x1587   :  { %1942 = vst [vmem:[#allocation10] sm:$0xff] %v1937_v11 }
0x158c   :  { %v1939_v12 = vpop.f32.mrf.mxu3 }
0x158d   :  { %v1940_v13 = vadd.f32 %v1939_v12, %v1912_v4 }
0x158f   :  { %1943 = vst [vmem:[#allocation10 + $0x8] sm:$0xff] %v1940_v13 }
0x1590   :  { %1956 = dma.vmem_to_hbm [thread:$0]  %s1949_s5, 256, %s1951_s0, [#allocation4], %s3540_s17, %s3540_s17, %s2406_s25  }
0x1591   :  { %2402 = dma.done.wait [#allocation4], 256  }
0x1592   :  { %2403 = vsyncadd [#allocation4], 4294967040 }
0x1593   :  { %1961 = vsyncpa [#allocation3], 1 }
0x1594   :  { %1962 = vsyncpa [#allocation6], 1 }
0x1595   :  { %1963 = vsyncpa [#allocation9], 1 }
0x1596   :  { %1964 = vsyncpa [#allocation4], 1 }

</bundles_post_ra>
